<compile_context>
chip_gen: v6e
topology: v6e:2x2x1
jax: 0.10.0
libtpu: 0.0.40
codegen_flags: <defaults>
</compile_context>

<pallas_src>
import functools

import jax
import jax.numpy as jnp
import numpy as np
from jax.experimental import pallas as pl
from jax.experimental.pallas import tpu as pltpu

# ---- module hyper-parameters (SwinTransformerBlock1D(dim=32, num_heads=4, window_size=8)) ----
DIM = 32
NUM_HEADS = 4
HEAD_DIM = DIM // NUM_HEADS
WINDOW = 8
MLP_RATIO = 4.0
MLP_HIDDEN = int(DIM * MLP_RATIO)
LN_EPS = 1e-5
QK_SCALE = HEAD_DIM ** (-0.5)
MAX_WINDOWS_PER_STEP = 128          # 128 windows * 8 rows * 32 ch * 4 B ~= 128 KiB per buffer


def _gelu_exact(x):
    # nn.GELU() default = exact erf formulation
    return 0.5 * x * (1.0 + jax.lax.erf(x * 0.7071067811865476))


def swin_block_kernel(x_ref, g1_ref, b1_ref, wqkv_ref, bqkv_ref,
                      wprojh_ref, bproj_ref, bias_ref,
                      g2_ref, b2_ref, w1_ref, b1m_ref, w2_ref, b2m_ref,
                      o_ref, *, nw_tile):
    rows = nw_tile * WINDOW
    x = x_ref[...].astype(jnp.float32)                                   # (rows, C)

    # --- LayerNorm 1 (f32 VPU path) ---
    mu = jnp.mean(x, axis=-1, keepdims=True)
    var = jnp.mean(jnp.square(x - mu), axis=-1, keepdims=True)
    xn = (x - mu) * jax.lax.rsqrt(var + LN_EPS) * g1_ref[...] + b1_ref[...]

    # --- QKV projection: bf16 operands, f32 MXU accumulation ---
    qkv = jnp.dot(xn.astype(jnp.bfloat16), wqkv_ref[...],
                  preferred_element_type=jnp.float32) + bqkv_ref[...]    # (rows, 3C)

    # Window view: rows = nw_tile * 8, so this reshape is a tile-aligned major-dim split.
    qw = (qkv[:, :DIM] * QK_SCALE).reshape(nw_tile, WINDOW, DIM).astype(jnp.bfloat16)
    kw = qkv[:, DIM:2 * DIM].reshape(nw_tile, WINDOW, DIM).astype(jnp.bfloat16)
    vw = qkv[:, 2 * DIM:].reshape(nw_tile, WINDOW, DIM).astype(jnp.bfloat16)

    # --- window multi-head attention, batched over every window in this tile ---
    attn_acc = jnp.zeros((rows, DIM), jnp.float32)
    for h in range(NUM_HEADS):                        # static unroll (head_dim = 8)
        hs = slice(h * HEAD_DIM, (h + 1) * HEAD_DIM)
        s = jnp.einsum('nqd,nkd->nqk', qw[:, :, hs], kw[:, :, hs],
                       preferred_element_type=jnp.float32)               # (nw, W, W)
        s = s + bias_ref[h]                                              # rel-pos bias
        s = s - jnp.max(s, axis=-1, keepdims=True)
        p = jnp.exp(s)
        p = p * pl.reciprocal(jnp.sum(p, axis=-1, keepdims=True), approx=True)
        o_h = jnp.einsum('nqk,nkd->nqd', p.astype(jnp.bfloat16), vw[:, :, hs],
                         preferred_element_type=jnp.float32)             # (nw, W, D)
        # Fold this head straight into the output projection (no concatenate).
        attn_acc = attn_acc + jnp.dot(
            o_h.reshape(rows, HEAD_DIM).astype(jnp.bfloat16), wprojh_ref[h],
            preferred_element_type=jnp.float32)

    # --- residual 1 (shortcut is the un-normalized input) ---
    x1 = x + attn_acc + bproj_ref[...]

    # --- LayerNorm 2 + MLP (GELU) ---
    mu2 = jnp.mean(x1, axis=-1, keepdims=True)
    var2 = jnp.mean(jnp.square(x1 - mu2), axis=-1, keepdims=True)
    xn2 = (x1 - mu2) * jax.lax.rsqrt(var2 + LN_EPS) * g2_ref[...] + b2_ref[...]
    hdn = jnp.dot(xn2.astype(jnp.bfloat16), w1_ref[...],
                  preferred_element_type=jnp.float32) + b1m_ref[...]
    hdn = _gelu_exact(hdn)
    mlp = jnp.dot(hdn.astype(jnp.bfloat16), w2_ref[...],
                  preferred_element_type=jnp.float32) + b2m_ref[...]

    # --- residual 2 ---
    o_ref[...] = (x1 + mlp).astype(o_ref.dtype)


def swin_block_forward(x, params, rel_bias, mask_matrix=None,
                       max_windows_per_step=MAX_WINDOWS_PER_STEP):
    """x: (B, L, C) float32.  mask_matrix unused (shift_size == 0)."""
    B, L, C = x.shape
    assert C == DIM and L % WINDOW == 0
    n_win = (B * L) // WINDOW
    nw_tile = min(max_windows_per_step, n_win)
    n_steps = -(-n_win // nw_tile)
    n_win_pad = n_steps * nw_tile
    rows_tile = nw_tile * WINDOW
    total_rows = n_win_pad * WINDOW

    xf = x.reshape(B * L, C)
    if total_rows != B * L:                      # pad with zero windows (sliced off below)
        xf = jnp.pad(xf, ((0, total_rows - B * L), (0, 0)))

    # Cast matmul weights to bf16 once (MXU-native); LN params / biases stay f32.
    wqkv_bf = params["wqkv_t"].astype(jnp.bfloat16)                                   # (C, 3C)
    wprojh_bf = params["wproj_t"].reshape(NUM_HEADS, HEAD_DIM, DIM).astype(jnp.bfloat16)
    w1_bf = params["w1_t"].astype(jnp.bfloat16)                                       # (C, H)
    w2_bf = params["w2_t"].astype(jnp.bfloat16)                                       # (H, C)

    def full(shape):
        return pl.BlockSpec(shape, lambda i, _s=shape: (0,) * len(_s))

    flops = total_rows * (2 * C * 3 * C + 2 * C * C
                          + 2 * 2 * WINDOW * C + 2 * 2 * C * MLP_HIDDEN)
    transcendentals = total_rows * (NUM_HEADS * WINDOW + MLP_HIDDEN + 2)
    bytes_accessed = 2 * total_rows * C * 4 + 2 * (3 * C * C + C * C + 2 * C * MLP_HIDDEN)

    kernel = functools.partial(swin_block_kernel, nw_tile=nw_tile)

    out = pl.pallas_call(
        kernel,
        out_shape=jax.ShapeDtypeStruct((total_rows, C), x.dtype),
        grid=(n_steps,),
        in_specs=[
            pl.BlockSpec((rows_tile, C), lambda i: (i, 0)),       # x row-tile (many windows)
            full((1, C)), full((1, C)),                           # LN1 gamma/beta
            full((C, 3 * C)), full((1, 3 * C)),                   # qkv weight^T (bf16) / bias
            full((NUM_HEADS, HEAD_DIM, C)), full((1, C)),         # proj weight per head (bf16) / bias
            full((NUM_HEADS, WINDOW, WINDOW)),                    # relative position bias
            full((1, C)), full((1, C)),                           # LN2 gamma/beta
            full((C, MLP_HIDDEN)), full((1, MLP_HIDDEN)),         # fc1 weight^T (bf16) / bias
            full((MLP_HIDDEN, C)), full((1, C)),                  # fc2 weight^T (bf16) / bias
        ],
        out_specs=pl.BlockSpec((rows_tile, C), lambda i: (i, 0)),
        compiler_params=pltpu.CompilerParams(dimension_semantics=("parallel",)),
        cost_estimate=pl.CostEstimate(flops=flops,
                                      transcendentals=transcendentals,
                                      bytes_accessed=bytes_accessed),
    )(xf, params["g1"], params["b1"], wqkv_bf, params["bqkv"],
      wprojh_bf, params["bproj"], rel_bias,
      params["g2"], params["b2"], w1_bf, params["b1m"],
      w2_bf, params["b2m"])

    return out[:B * L].reshape(B, L, C)


# ----------------------------- parameter setup -----------------------------
def make_params(key):
    ks = jax.random.split(key, 8)
    return {
        "g1": jnp.ones((1, DIM), jnp.float32),
        "b1": jnp.zeros((1, DIM), jnp.float32),
        "wqkv_t": 0.02 * jax.random.normal(ks[0], (DIM, 3 * DIM), jnp.float32),
        "bqkv": 0.02 * jax.random.normal(ks[1], (1, 3 * DIM), jnp.float32),
        "wproj_t": 0.02 * jax.random.normal(ks[2], (DIM, DIM), jnp.float32),
        "bproj": 0.02 * jax.random.normal(ks[3], (1, DIM), jnp.float32),
        "g2": jnp.ones((1, DIM), jnp.float32),
        "b2": jnp.zeros((1, DIM), jnp.float32),
        "w1_t": 0.02 * jax.random.normal(ks[4], (DIM, MLP_HIDDEN), jnp.float32),
        "b1m": 0.02 * jax.random.normal(ks[5], (1, MLP_HIDDEN), jnp.float32),
        "w2_t": 0.02 * jax.random.normal(ks[6], (MLP_HIDDEN, DIM), jnp.float32),
        "b2m": 0.02 * jax.random.normal(ks[7], (1, DIM), jnp.float32),
    }


def make_rel_bias(key):
    # relative_position_bias_table: (2*W-1, num_heads)
    table = 0.02 * jax.random.normal(key, (2 * WINDOW - 1, NUM_HEADS), jnp.float32)
    coords = jnp.arange(WINDOW)
    rel_idx = coords[:, None] - coords[None, :] + (WINDOW - 1)            # (W, W)
    bias = table[rel_idx]                                                 # (W, W, H)
    return jnp.transpose(bias, (2, 0, 1))                                 # (H, W, W)


# ----------------------------- pure-JAX reference -----------------------------
def reference_forward(x, params, rel_bias):
    B, L, C = x.shape

    def ln(v, g, b):
        mu = v.mean(-1, keepdims=True)
        var = ((v - mu) ** 2).mean(-1, keepdims=True)
        return (v - mu) / jnp.sqrt(var + LN_EPS) * g + b

    hp = jax.lax.Precision.HIGHEST
    xn = ln(x, params["g1"][0], params["b1"][0])
    xw = xn.reshape(B * L // WINDOW, WINDOW, C)
    qkv = jnp.einsum("wnc,cd->wnd", xw, params["wqkv_t"], precision=hp) + params["bqkv"][0]
    qkv = qkv.reshape(-1, WINDOW, 3, NUM_HEADS, HEAD_DIM).transpose(2, 0, 3, 1, 4)
    q, k, v = qkv[0] * QK_SCALE, qkv[1], qkv[2]
    attn = jnp.einsum("whnd,whmd->whnm", q, k, precision=hp) + rel_bias[None]
    attn = jax.nn.softmax(attn, axis=-1)
    out = jnp.einsum("whnm,whmd->whnd", attn, v, precision=hp)
    out = out.transpose(0, 2, 1, 3).reshape(-1, WINDOW, C)
    out = jnp.einsum("wnc,cd->wnd", out, params["wproj_t"], precision=hp) + params["bproj"][0]
    x1 = x + out.reshape(B, L, C)

    xn2 = ln(x1, params["g2"][0], params["b2"][0])
    h = _gelu_exact(jnp.einsum("blc,ch->blh", xn2, params["w1_t"], precision=hp) + params["b1m"][0])
    mlp = jnp.einsum("blh,hc->blc", h, params["w2_t"], precision=hp) + params["b2m"][0]
    return x1 + mlp


if __name__ == "__main__":
    key = jax.random.PRNGKey(0)
    kx, kp, kb = jax.random.split(key, 3)

    B, L, C = 2, 16, DIM                       # small shapes: B=2, seq=16, dim=32
    x = jax.random.normal(kx, (B, L, C), jnp.float32)
    params = make_params(kp)
    rel_bias = make_rel_bias(kb)

    y = swin_block_forward(x, params, rel_bias, mask_matrix=None)
    y = jax.block_until_ready(y)

    y_ref = reference_forward(x, params, rel_bias)
    np.testing.assert_allclose(np.asarray(y), np.asarray(y_ref), rtol=1e-2, atol=1e-2)

    print("KERNEL_OK")
</pallas_src>

<mosaic_0001>
module attributes {stable_mosaic.version = 11 : i64} {
  func.func @swin_block_kernel(%arg0: i32, %arg1: memref<32x32xf32, #tpu.memory_space<vmem>>, %arg2: memref<1x32xf32, #tpu.memory_space<vmem>>, %arg3: memref<1x32xf32, #tpu.memory_space<vmem>>, %arg4: memref<32x96xbf16, #tpu.memory_space<vmem>>, %arg5: memref<1x96xf32, #tpu.memory_space<vmem>>, %arg6: memref<4x8x32xbf16, #tpu.memory_space<vmem>>, %arg7: memref<1x32xf32, #tpu.memory_space<vmem>>, %arg8: memref<4x8x8xf32, #tpu.memory_space<vmem>>, %arg9: memref<1x32xf32, #tpu.memory_space<vmem>>, %arg10: memref<1x32xf32, #tpu.memory_space<vmem>>, %arg11: memref<32x128xbf16, #tpu.memory_space<vmem>>, %arg12: memref<1x128xf32, #tpu.memory_space<vmem>>, %arg13: memref<128x32xbf16, #tpu.memory_space<vmem>>, %arg14: memref<1x32xf32, #tpu.memory_space<vmem>>, %arg15: memref<32x32xf32, #tpu.memory_space<vmem>>) attributes {dimension_semantics = [#tpu.dimension_semantics<parallel>], iteration_bounds = array<i64: 1>, scalar_prefetch = 0 : i64, scratch_operands = 0 : i64, tpu.core_type = #tpu.core_type<tc>, window_params = [{transform_indices = @transform_0, window_bounds = array<i64: 32, 32>}, {pipeline_mode = #tpu.pipeline_mode<synchronous>, transform_indices = @transform_1, window_bounds = array<i64: 1, 32>}, {pipeline_mode = #tpu.pipeline_mode<synchronous>, transform_indices = @transform_2, window_bounds = array<i64: 1, 32>}, {pipeline_mode = #tpu.pipeline_mode<synchronous>, transform_indices = @transform_3, window_bounds = array<i64: 32, 96>}, {pipeline_mode = #tpu.pipeline_mode<synchronous>, transform_indices = @transform_4, window_bounds = array<i64: 1, 96>}, {pipeline_mode = #tpu.pipeline_mode<synchronous>, transform_indices = @transform_5, window_bounds = array<i64: 4, 8, 32>}, {pipeline_mode = #tpu.pipeline_mode<synchronous>, transform_indices = @transform_6, window_bounds = array<i64: 1, 32>}, {pipeline_mode = #tpu.pipeline_mode<synchronous>, transform_indices = @transform_7, window_bounds = array<i64: 4, 8, 8>}, {pipeline_mode = #tpu.pipeline_mode<synchronous>, transform_indices = @transform_8, window_bounds = array<i64: 1, 32>}, {pipeline_mode = #tpu.pipeline_mode<synchronous>, transform_indices = @transform_9, window_bounds = array<i64: 1, 32>}, {pipeline_mode = #tpu.pipeline_mode<synchronous>, transform_indices = @transform_10, window_bounds = array<i64: 32, 128>}, {pipeline_mode = #tpu.pipeline_mode<synchronous>, transform_indices = @transform_11, window_bounds = array<i64: 1, 128>}, {pipeline_mode = #tpu.pipeline_mode<synchronous>, transform_indices = @transform_12, window_bounds = array<i64: 128, 32>}, {pipeline_mode = #tpu.pipeline_mode<synchronous>, transform_indices = @transform_13, window_bounds = array<i64: 1, 32>}, {transform_indices = @transform_14, window_bounds = array<i64: 32, 32>}]} {
    %c0 = arith.constant 0 : index
    %c0_0 = arith.constant 0 : index
    %0 = vector.load %arg1[%c0, %c0_0] : memref<32x32xf32, #tpu.memory_space<vmem>>, vector<32x32xf32>
    %cst = arith.constant dense<0.000000e+00> : vector<32xf32>
    %1 = vector.multi_reduction <add>, %0, %cst [1] : vector<32x32xf32> to vector<32xf32>
    %2 = vector.shape_cast %1 : vector<32xf32> to vector<32x1xf32>
    %cst_1 = arith.constant 3.200000e+01 : f32
    %3 = vector.broadcast %cst_1 : f32 to vector<32x1xf32>
    %4 = arith.divf %2, %3 : vector<32x1xf32>
    %5 = vector.broadcast %4 : vector<32x1xf32> to vector<32x32xf32>
    %6 = arith.subf %0, %5 : vector<32x32xf32>
    %7 = arith.mulf %6, %6 : vector<32x32xf32>
    %cst_2 = arith.constant dense<0.000000e+00> : vector<32xf32>
    %8 = vector.multi_reduction <add>, %7, %cst_2 [1] : vector<32x32xf32> to vector<32xf32>
    %9 = vector.shape_cast %8 : vector<32xf32> to vector<32x1xf32>
    %cst_3 = arith.constant 3.200000e+01 : f32
    %10 = vector.broadcast %cst_3 : f32 to vector<32x1xf32>
    %11 = arith.divf %9, %10 : vector<32x1xf32>
    %12 = vector.broadcast %4 : vector<32x1xf32> to vector<32x32xf32>
    %13 = arith.subf %0, %12 : vector<32x32xf32>
    %cst_4 = arith.constant 9.99999974E-6 : f32
    %14 = vector.broadcast %cst_4 : f32 to vector<32x1xf32>
    %15 = arith.addf %11, %14 : vector<32x1xf32>
    %16 = math.rsqrt %15 : vector<32x1xf32>
    %17 = vector.broadcast %16 : vector<32x1xf32> to vector<32x32xf32>
    %18 = arith.mulf %13, %17 : vector<32x32xf32>
    %c0_5 = arith.constant 0 : index
    %c0_6 = arith.constant 0 : index
    %19 = vector.load %arg2[%c0_5, %c0_6] : memref<1x32xf32, #tpu.memory_space<vmem>>, vector<1x32xf32>
    %20 = vector.broadcast %19 : vector<1x32xf32> to vector<32x32xf32>
    %21 = arith.mulf %18, %20 : vector<32x32xf32>
    %c0_7 = arith.constant 0 : index
    %c0_8 = arith.constant 0 : index
    %22 = vector.load %arg3[%c0_7, %c0_8] : memref<1x32xf32, #tpu.memory_space<vmem>>, vector<1x32xf32>
    %23 = vector.broadcast %22 : vector<1x32xf32> to vector<32x32xf32>
    %24 = arith.addf %21, %23 : vector<32x32xf32>
    %25 = arith.truncf %24 : vector<32x32xf32> to vector<32x32xbf16>
    %c0_9 = arith.constant 0 : index
    %c0_10 = arith.constant 0 : index
    %26 = vector.load %arg4[%c0_9, %c0_10] : memref<32x96xbf16, #tpu.memory_space<vmem>>, vector<32x96xbf16>
    %cst_11 = arith.constant dense<0.000000e+00> : vector<32x96xf32>
    %27 = tpu.matmul %25, %26, %cst_11 {dimension_numbers = #tpu.dot_dimension_numbers<[1], [0], [0], [1], [0, 0, 1, 1], [], []>} : vector<32x32xbf16>, vector<32x96xbf16>, vector<32x96xf32> -> vector<32x96xf32>
    %c0_12 = arith.constant 0 : index
    %c0_13 = arith.constant 0 : index
    %28 = vector.load %arg5[%c0_12, %c0_13] : memref<1x96xf32, #tpu.memory_space<vmem>>, vector<1x96xf32>
    %29 = vector.broadcast %28 : vector<1x96xf32> to vector<32x96xf32>
    %30 = arith.addf %27, %29 : vector<32x96xf32>
    %31 = vector.extract_strided_slice %30 {offsets = [0, 0], sizes = [32, 32], strides = [1, 1]} : vector<32x96xf32> to vector<32x32xf32>
    %cst_14 = arith.constant 0.353553385 : f32
    %32 = vector.broadcast %cst_14 : f32 to vector<32x32xf32>
    %33 = arith.mulf %31, %32 : vector<32x32xf32>
    %34 = vector.shape_cast %33 : vector<32x32xf32> to vector<4x8x32xf32>
    %35 = arith.truncf %34 : vector<4x8x32xf32> to vector<4x8x32xbf16>
    %36 = vector.extract_strided_slice %30 {offsets = [0, 32], sizes = [32, 32], strides = [1, 1]} : vector<32x96xf32> to vector<32x32xf32>
    %37 = vector.shape_cast %36 : vector<32x32xf32> to vector<4x8x32xf32>
    %38 = arith.truncf %37 : vector<4x8x32xf32> to vector<4x8x32xbf16>
    %39 = vector.extract_strided_slice %30 {offsets = [0, 64], sizes = [32, 32], strides = [1, 1]} : vector<32x96xf32> to vector<32x32xf32>
    %40 = vector.shape_cast %39 : vector<32x32xf32> to vector<4x8x32xf32>
    %41 = arith.truncf %40 : vector<4x8x32xf32> to vector<4x8x32xbf16>
    %cst_15 = arith.constant 0.000000e+00 : f32
    %42 = vector.broadcast %cst_15 : f32 to vector<32x32xf32>
    %43 = vector.extract_strided_slice %35 {offsets = [0, 0, 0], sizes = [4, 8, 8], strides = [1, 1, 1]} : vector<4x8x32xbf16> to vector<4x8x8xbf16>
    %44 = vector.extract_strided_slice %38 {offsets = [0, 0, 0], sizes = [4, 8, 8], strides = [1, 1, 1]} : vector<4x8x32xbf16> to vector<4x8x8xbf16>
    "tpu.trace_start"() <{level = 10 : i32, message = "nqd,nkd->nqk"}> : () -> ()
    %cst_16 = arith.constant dense<0.000000e+00> : vector<4x8x8xf32>
    %45 = tpu.matmul %43, %44, %cst_16 {dimension_numbers = #tpu.dot_dimension_numbers<[2], [2], [1], [1], [0, 0, 0, 1, 1, 1], [0], [0]>} : vector<4x8x8xbf16>, vector<4x8x8xbf16>, vector<4x8x8xf32> -> vector<4x8x8xf32>
    "tpu.trace_stop"() : () -> ()
    %c0_17 = arith.constant 0 : index
    %c0_18 = arith.constant 0 : index
    %c0_19 = arith.constant 0 : index
    %46 = vector.load %arg8[%c0_17, %c0_18, %c0_19] : memref<4x8x8xf32, #tpu.memory_space<vmem>>, vector<1x8x8xf32>
    %47 = vector.shape_cast %46 : vector<1x8x8xf32> to vector<8x8xf32>
    %48 = vector.shape_cast %47 : vector<8x8xf32> to vector<1x8x8xf32>
    %49 = vector.broadcast %48 : vector<1x8x8xf32> to vector<4x8x8xf32>
    %50 = arith.addf %45, %49 : vector<4x8x8xf32>
    %cst_20 = arith.constant dense<0xFF800000> : vector<4x8xf32>
    %51 = vector.multi_reduction <maximumf>, %50, %cst_20 [2] : vector<4x8x8xf32> to vector<4x8xf32>
    %52 = vector.shape_cast %51 : vector<4x8xf32> to vector<4x8x1xf32>
    %53 = vector.broadcast %52 : vector<4x8x1xf32> to vector<4x8x8xf32>
    %54 = arith.subf %50, %53 : vector<4x8x8xf32>
    %55 = math.exp %54 : vector<4x8x8xf32>
    %cst_21 = arith.constant dense<0.000000e+00> : vector<4x8xf32>
    %56 = vector.multi_reduction <add>, %55, %cst_21 [2] : vector<4x8x8xf32> to vector<4x8xf32>
    %57 = vector.shape_cast %56 : vector<4x8xf32> to vector<4x8x1xf32>
    %58 = tpu.reciprocal %57 {approx = true} : vector<4x8x1xf32> -> vector<4x8x1xf32>
    %59 = vector.broadcast %58 : vector<4x8x1xf32> to vector<4x8x8xf32>
    %60 = arith.mulf %55, %59 : vector<4x8x8xf32>
    %61 = arith.truncf %60 : vector<4x8x8xf32> to vector<4x8x8xbf16>
    %62 = vector.extract_strided_slice %41 {offsets = [0, 0, 0], sizes = [4, 8, 8], strides = [1, 1, 1]} : vector<4x8x32xbf16> to vector<4x8x8xbf16>
    "tpu.trace_start"() <{level = 10 : i32, message = "nqk,nkd->nqd"}> : () -> ()
    %cst_22 = arith.constant dense<0.000000e+00> : vector<4x8x8xf32>
    %63 = tpu.matmul %61, %62, %cst_22 {dimension_numbers = #tpu.dot_dimension_numbers<[2], [1], [1], [2], [0, 0, 0, 1, 1, 2], [0], [0]>} : vector<4x8x8xbf16>, vector<4x8x8xbf16>, vector<4x8x8xf32> -> vector<4x8x8xf32>
    "tpu.trace_stop"() : () -> ()
    %64 = vector.shape_cast %63 : vector<4x8x8xf32> to vector<32x8xf32>
    %65 = arith.truncf %64 : vector<32x8xf32> to vector<32x8xbf16>
    %c0_23 = arith.constant 0 : index
    %c0_24 = arith.constant 0 : index
    %c0_25 = arith.constant 0 : index
    %66 = vector.load %arg6[%c0_23, %c0_24, %c0_25] : memref<4x8x32xbf16, #tpu.memory_space<vmem>>, vector<1x8x32xbf16>
    %67 = vector.shape_cast %66 : vector<1x8x32xbf16> to vector<8x32xbf16>
    %cst_26 = arith.constant dense<0.000000e+00> : vector<32x32xf32>
    %68 = tpu.matmul %65, %67, %cst_26 {dimension_numbers = #tpu.dot_dimension_numbers<[1], [0], [0], [1], [0, 0, 1, 1], [], []>} : vector<32x8xbf16>, vector<8x32xbf16>, vector<32x32xf32> -> vector<32x32xf32>
    %69 = arith.addf %42, %68 : vector<32x32xf32>
    %70 = vector.extract_strided_slice %35 {offsets = [0, 0, 8], sizes = [4, 8, 8], strides = [1, 1, 1]} : vector<4x8x32xbf16> to vector<4x8x8xbf16>
    %71 = vector.extract_strided_slice %38 {offsets = [0, 0, 8], sizes = [4, 8, 8], strides = [1, 1, 1]} : vector<4x8x32xbf16> to vector<4x8x8xbf16>
    "tpu.trace_start"() <{level = 10 : i32, message = "nqd,nkd->nqk"}> : () -> ()
    %cst_27 = arith.constant dense<0.000000e+00> : vector<4x8x8xf32>
    %72 = tpu.matmul %70, %71, %cst_27 {dimension_numbers = #tpu.dot_dimension_numbers<[2], [2], [1], [1], [0, 0, 0, 1, 1, 1], [0], [0]>} : vector<4x8x8xbf16>, vector<4x8x8xbf16>, vector<4x8x8xf32> -> vector<4x8x8xf32>
    "tpu.trace_stop"() : () -> ()
    %c1 = arith.constant 1 : index
    %c0_28 = arith.constant 0 : index
    %c0_29 = arith.constant 0 : index
    %73 = vector.load %arg8[%c1, %c0_28, %c0_29] : memref<4x8x8xf32, #tpu.memory_space<vmem>>, vector<1x8x8xf32>
    %74 = vector.shape_cast %73 : vector<1x8x8xf32> to vector<8x8xf32>
    %75 = vector.shape_cast %74 : vector<8x8xf32> to vector<1x8x8xf32>
    %76 = vector.broadcast %75 : vector<1x8x8xf32> to vector<4x8x8xf32>
    %77 = arith.addf %72, %76 : vector<4x8x8xf32>
    %cst_30 = arith.constant dense<0xFF800000> : vector<4x8xf32>
    %78 = vector.multi_reduction <maximumf>, %77, %cst_30 [2] : vector<4x8x8xf32> to vector<4x8xf32>
    %79 = vector.shape_cast %78 : vector<4x8xf32> to vector<4x8x1xf32>
    %80 = vector.broadcast %79 : vector<4x8x1xf32> to vector<4x8x8xf32>
    %81 = arith.subf %77, %80 : vector<4x8x8xf32>
    %82 = math.exp %81 : vector<4x8x8xf32>
    %cst_31 = arith.constant dense<0.000000e+00> : vector<4x8xf32>
    %83 = vector.multi_reduction <add>, %82, %cst_31 [2] : vector<4x8x8xf32> to vector<4x8xf32>
    %84 = vector.shape_cast %83 : vector<4x8xf32> to vector<4x8x1xf32>
    %85 = tpu.reciprocal %84 {approx = true} : vector<4x8x1xf32> -> vector<4x8x1xf32>
    %86 = vector.broadcast %85 : vector<4x8x1xf32> to vector<4x8x8xf32>
    %87 = arith.mulf %82, %86 : vector<4x8x8xf32>
    %88 = arith.truncf %87 : vector<4x8x8xf32> to vector<4x8x8xbf16>
    %89 = vector.extract_strided_slice %41 {offsets = [0, 0, 8], sizes = [4, 8, 8], strides = [1, 1, 1]} : vector<4x8x32xbf16> to vector<4x8x8xbf16>
    "tpu.trace_start"() <{level = 10 : i32, message = "nqk,nkd->nqd"}> : () -> ()
    %cst_32 = arith.constant dense<0.000000e+00> : vector<4x8x8xf32>
    %90 = tpu.matmul %88, %89, %cst_32 {dimension_numbers = #tpu.dot_dimension_numbers<[2], [1], [1], [2], [0, 0, 0, 1, 1, 2], [0], [0]>} : vector<4x8x8xbf16>, vector<4x8x8xbf16>, vector<4x8x8xf32> -> vector<4x8x8xf32>
    "tpu.trace_stop"() : () -> ()
    %91 = vector.shape_cast %90 : vector<4x8x8xf32> to vector<32x8xf32>
    %92 = arith.truncf %91 : vector<32x8xf32> to vector<32x8xbf16>
    %c1_33 = arith.constant 1 : index
    %c0_34 = arith.constant 0 : index
    %c0_35 = arith.constant 0 : index
    %93 = vector.load %arg6[%c1_33, %c0_34, %c0_35] : memref<4x8x32xbf16, #tpu.memory_space<vmem>>, vector<1x8x32xbf16>
    %94 = vector.shape_cast %93 : vector<1x8x32xbf16> to vector<8x32xbf16>
    %cst_36 = arith.constant dense<0.000000e+00> : vector<32x32xf32>
    %95 = tpu.matmul %92, %94, %cst_36 {dimension_numbers = #tpu.dot_dimension_numbers<[1], [0], [0], [1], [0, 0, 1, 1], [], []>} : vector<32x8xbf16>, vector<8x32xbf16>, vector<32x32xf32> -> vector<32x32xf32>
    %96 = arith.addf %69, %95 : vector<32x32xf32>
    %97 = vector.extract_strided_slice %35 {offsets = [0, 0, 16], sizes = [4, 8, 8], strides = [1, 1, 1]} : vector<4x8x32xbf16> to vector<4x8x8xbf16>
    %98 = vector.extract_strided_slice %38 {offsets = [0, 0, 16], sizes = [4, 8, 8], strides = [1, 1, 1]} : vector<4x8x32xbf16> to vector<4x8x8xbf16>
    "tpu.trace_start"() <{level = 10 : i32, message = "nqd,nkd->nqk"}> : () -> ()
    %cst_37 = arith.constant dense<0.000000e+00> : vector<4x8x8xf32>
    %99 = tpu.matmul %97, %98, %cst_37 {dimension_numbers = #tpu.dot_dimension_numbers<[2], [2], [1], [1], [0, 0, 0, 1, 1, 1], [0], [0]>} : vector<4x8x8xbf16>, vector<4x8x8xbf16>, vector<4x8x8xf32> -> vector<4x8x8xf32>
    "tpu.trace_stop"() : () -> ()
    %c2 = arith.constant 2 : index
    %c0_38 = arith.constant 0 : index
    %c0_39 = arith.constant 0 : index
    %100 = vector.load %arg8[%c2, %c0_38, %c0_39] : memref<4x8x8xf32, #tpu.memory_space<vmem>>, vector<1x8x8xf32>
    %101 = vector.shape_cast %100 : vector<1x8x8xf32> to vector<8x8xf32>
    %102 = vector.shape_cast %101 : vector<8x8xf32> to vector<1x8x8xf32>
    %103 = vector.broadcast %102 : vector<1x8x8xf32> to vector<4x8x8xf32>
    %104 = arith.addf %99, %103 : vector<4x8x8xf32>
    %cst_40 = arith.constant dense<0xFF800000> : vector<4x8xf32>
    %105 = vector.multi_reduction <maximumf>, %104, %cst_40 [2] : vector<4x8x8xf32> to vector<4x8xf32>
    %106 = vector.shape_cast %105 : vector<4x8xf32> to vector<4x8x1xf32>
    %107 = vector.broadcast %106 : vector<4x8x1xf32> to vector<4x8x8xf32>
    %108 = arith.subf %104, %107 : vector<4x8x8xf32>
    %109 = math.exp %108 : vector<4x8x8xf32>
    %cst_41 = arith.constant dense<0.000000e+00> : vector<4x8xf32>
    %110 = vector.multi_reduction <add>, %109, %cst_41 [2] : vector<4x8x8xf32> to vector<4x8xf32>
    %111 = vector.shape_cast %110 : vector<4x8xf32> to vector<4x8x1xf32>
    %112 = tpu.reciprocal %111 {approx = true} : vector<4x8x1xf32> -> vector<4x8x1xf32>
    %113 = vector.broadcast %112 : vector<4x8x1xf32> to vector<4x8x8xf32>
    %114 = arith.mulf %109, %113 : vector<4x8x8xf32>
    %115 = arith.truncf %114 : vector<4x8x8xf32> to vector<4x8x8xbf16>
    %116 = vector.extract_strided_slice %41 {offsets = [0, 0, 16], sizes = [4, 8, 8], strides = [1, 1, 1]} : vector<4x8x32xbf16> to vector<4x8x8xbf16>
    "tpu.trace_start"() <{level = 10 : i32, message = "nqk,nkd->nqd"}> : () -> ()
    %cst_42 = arith.constant dense<0.000000e+00> : vector<4x8x8xf32>
    %117 = tpu.matmul %115, %116, %cst_42 {dimension_numbers = #tpu.dot_dimension_numbers<[2], [1], [1], [2], [0, 0, 0, 1, 1, 2], [0], [0]>} : vector<4x8x8xbf16>, vector<4x8x8xbf16>, vector<4x8x8xf32> -> vector<4x8x8xf32>
    "tpu.trace_stop"() : () -> ()
    %118 = vector.shape_cast %117 : vector<4x8x8xf32> to vector<32x8xf32>
    %119 = arith.truncf %118 : vector<32x8xf32> to vector<32x8xbf16>
    %c2_43 = arith.constant 2 : index
    %c0_44 = arith.constant 0 : index
    %c0_45 = arith.constant 0 : index
    %120 = vector.load %arg6[%c2_43, %c0_44, %c0_45] : memref<4x8x32xbf16, #tpu.memory_space<vmem>>, vector<1x8x32xbf16>
    %121 = vector.shape_cast %120 : vector<1x8x32xbf16> to vector<8x32xbf16>
    %cst_46 = arith.constant dense<0.000000e+00> : vector<32x32xf32>
    %122 = tpu.matmul %119, %121, %cst_46 {dimension_numbers = #tpu.dot_dimension_numbers<[1], [0], [0], [1], [0, 0, 1, 1], [], []>} : vector<32x8xbf16>, vector<8x32xbf16>, vector<32x32xf32> -> vector<32x32xf32>
    %123 = arith.addf %96, %122 : vector<32x32xf32>
    %124 = vector.extract_strided_slice %35 {offsets = [0, 0, 24], sizes = [4, 8, 8], strides = [1, 1, 1]} : vector<4x8x32xbf16> to vector<4x8x8xbf16>
    %125 = vector.extract_strided_slice %38 {offsets = [0, 0, 24], sizes = [4, 8, 8], strides = [1, 1, 1]} : vector<4x8x32xbf16> to vector<4x8x8xbf16>
    "tpu.trace_start"() <{level = 10 : i32, message = "nqd,nkd->nqk"}> : () -> ()
    %cst_47 = arith.constant dense<0.000000e+00> : vector<4x8x8xf32>
    %126 = tpu.matmul %124, %125, %cst_47 {dimension_numbers = #tpu.dot_dimension_numbers<[2], [2], [1], [1], [0, 0, 0, 1, 1, 1], [0], [0]>} : vector<4x8x8xbf16>, vector<4x8x8xbf16>, vector<4x8x8xf32> -> vector<4x8x8xf32>
    "tpu.trace_stop"() : () -> ()
    %c3 = arith.constant 3 : index
    %c0_48 = arith.constant 0 : index
    %c0_49 = arith.constant 0 : index
    %127 = vector.load %arg8[%c3, %c0_48, %c0_49] : memref<4x8x8xf32, #tpu.memory_space<vmem>>, vector<1x8x8xf32>
    %128 = vector.shape_cast %127 : vector<1x8x8xf32> to vector<8x8xf32>
    %129 = vector.shape_cast %128 : vector<8x8xf32> to vector<1x8x8xf32>
    %130 = vector.broadcast %129 : vector<1x8x8xf32> to vector<4x8x8xf32>
    %131 = arith.addf %126, %130 : vector<4x8x8xf32>
    %cst_50 = arith.constant dense<0xFF800000> : vector<4x8xf32>
    %132 = vector.multi_reduction <maximumf>, %131, %cst_50 [2] : vector<4x8x8xf32> to vector<4x8xf32>
    %133 = vector.shape_cast %132 : vector<4x8xf32> to vector<4x8x1xf32>
    %134 = vector.broadcast %133 : vector<4x8x1xf32> to vector<4x8x8xf32>
    %135 = arith.subf %131, %134 : vector<4x8x8xf32>
    %136 = math.exp %135 : vector<4x8x8xf32>
    %cst_51 = arith.constant dense<0.000000e+00> : vector<4x8xf32>
    %137 = vector.multi_reduction <add>, %136, %cst_51 [2] : vector<4x8x8xf32> to vector<4x8xf32>
    %138 = vector.shape_cast %137 : vector<4x8xf32> to vector<4x8x1xf32>
    %139 = tpu.reciprocal %138 {approx = true} : vector<4x8x1xf32> -> vector<4x8x1xf32>
    %140 = vector.broadcast %139 : vector<4x8x1xf32> to vector<4x8x8xf32>
    %141 = arith.mulf %136, %140 : vector<4x8x8xf32>
    %142 = arith.truncf %141 : vector<4x8x8xf32> to vector<4x8x8xbf16>
    %143 = vector.extract_strided_slice %41 {offsets = [0, 0, 24], sizes = [4, 8, 8], strides = [1, 1, 1]} : vector<4x8x32xbf16> to vector<4x8x8xbf16>
    "tpu.trace_start"() <{level = 10 : i32, message = "nqk,nkd->nqd"}> : () -> ()
    %cst_52 = arith.constant dense<0.000000e+00> : vector<4x8x8xf32>
    %144 = tpu.matmul %142, %143, %cst_52 {dimension_numbers = #tpu.dot_dimension_numbers<[2], [1], [1], [2], [0, 0, 0, 1, 1, 2], [0], [0]>} : vector<4x8x8xbf16>, vector<4x8x8xbf16>, vector<4x8x8xf32> -> vector<4x8x8xf32>
    "tpu.trace_stop"() : () -> ()
    %145 = vector.shape_cast %144 : vector<4x8x8xf32> to vector<32x8xf32>
    %146 = arith.truncf %145 : vector<32x8xf32> to vector<32x8xbf16>
    %c3_53 = arith.constant 3 : index
    %c0_54 = arith.constant 0 : index
    %c0_55 = arith.constant 0 : index
    %147 = vector.load %arg6[%c3_53, %c0_54, %c0_55] : memref<4x8x32xbf16, #tpu.memory_space<vmem>>, vector<1x8x32xbf16>
    %148 = vector.shape_cast %147 : vector<1x8x32xbf16> to vector<8x32xbf16>
    %cst_56 = arith.constant dense<0.000000e+00> : vector<32x32xf32>
    %149 = tpu.matmul %146, %148, %cst_56 {dimension_numbers = #tpu.dot_dimension_numbers<[1], [0], [0], [1], [0, 0, 1, 1], [], []>} : vector<32x8xbf16>, vector<8x32xbf16>, vector<32x32xf32> -> vector<32x32xf32>
    %150 = arith.addf %123, %149 : vector<32x32xf32>
    %151 = arith.addf %0, %150 : vector<32x32xf32>
    %c0_57 = arith.constant 0 : index
    %c0_58 = arith.constant 0 : index
    %152 = vector.load %arg7[%c0_57, %c0_58] : memref<1x32xf32, #tpu.memory_space<vmem>>, vector<1x32xf32>
    %153 = vector.broadcast %152 : vector<1x32xf32> to vector<32x32xf32>
    %154 = arith.addf %151, %153 : vector<32x32xf32>
    %cst_59 = arith.constant dense<0.000000e+00> : vector<32xf32>
    %155 = vector.multi_reduction <add>, %154, %cst_59 [1] : vector<32x32xf32> to vector<32xf32>
    %156 = vector.shape_cast %155 : vector<32xf32> to vector<32x1xf32>
    %cst_60 = arith.constant 3.200000e+01 : f32
    %157 = vector.broadcast %cst_60 : f32 to vector<32x1xf32>
    %158 = arith.divf %156, %157 : vector<32x1xf32>
    %159 = vector.broadcast %158 : vector<32x1xf32> to vector<32x32xf32>
    %160 = arith.subf %154, %159 : vector<32x32xf32>
    %161 = arith.mulf %160, %160 : vector<32x32xf32>
    %cst_61 = arith.constant dense<0.000000e+00> : vector<32xf32>
    %162 = vector.multi_reduction <add>, %161, %cst_61 [1] : vector<32x32xf32> to vector<32xf32>
    %163 = vector.shape_cast %162 : vector<32xf32> to vector<32x1xf32>
    %cst_62 = arith.constant 3.200000e+01 : f32
    %164 = vector.broadcast %cst_62 : f32 to vector<32x1xf32>
    %165 = arith.divf %163, %164 : vector<32x1xf32>
    %166 = vector.broadcast %158 : vector<32x1xf32> to vector<32x32xf32>
    %167 = arith.subf %154, %166 : vector<32x32xf32>
    %cst_63 = arith.constant 9.99999974E-6 : f32
    %168 = vector.broadcast %cst_63 : f32 to vector<32x1xf32>
    %169 = arith.addf %165, %168 : vector<32x1xf32>
    %170 = math.rsqrt %169 : vector<32x1xf32>
    %171 = vector.broadcast %170 : vector<32x1xf32> to vector<32x32xf32>
    %172 = arith.mulf %167, %171 : vector<32x32xf32>
    %c0_64 = arith.constant 0 : index
    %c0_65 = arith.constant 0 : index
    %173 = vector.load %arg9[%c0_64, %c0_65] : memref<1x32xf32, #tpu.memory_space<vmem>>, vector<1x32xf32>
    %174 = vector.broadcast %173 : vector<1x32xf32> to vector<32x32xf32>
    %175 = arith.mulf %172, %174 : vector<32x32xf32>
    %c0_66 = arith.constant 0 : index
    %c0_67 = arith.constant 0 : index
    %176 = vector.load %arg10[%c0_66, %c0_67] : memref<1x32xf32, #tpu.memory_space<vmem>>, vector<1x32xf32>
    %177 = vector.broadcast %176 : vector<1x32xf32> to vector<32x32xf32>
    %178 = arith.addf %175, %177 : vector<32x32xf32>
    %179 = arith.truncf %178 : vector<32x32xf32> to vector<32x32xbf16>
    %c0_68 = arith.constant 0 : index
    %c0_69 = arith.constant 0 : index
    %180 = vector.load %arg11[%c0_68, %c0_69] : memref<32x128xbf16, #tpu.memory_space<vmem>>, vector<32x128xbf16>
    %cst_70 = arith.constant dense<0.000000e+00> : vector<32x128xf32>
    %181 = tpu.matmul %179, %180, %cst_70 {dimension_numbers = #tpu.dot_dimension_numbers<[1], [0], [0], [1], [0, 0, 1, 1], [], []>} : vector<32x32xbf16>, vector<32x128xbf16>, vector<32x128xf32> -> vector<32x128xf32>
    %c0_71 = arith.constant 0 : index
    %c0_72 = arith.constant 0 : index
    %182 = vector.load %arg12[%c0_71, %c0_72] : memref<1x128xf32, #tpu.memory_space<vmem>>, vector<1x128xf32>
    %183 = vector.broadcast %182 : vector<1x128xf32> to vector<32x128xf32>
    %184 = arith.addf %181, %183 : vector<32x128xf32>
    %cst_73 = arith.constant 5.000000e-01 : f32
    %185 = vector.broadcast %cst_73 : f32 to vector<32x128xf32>
    %186 = arith.mulf %185, %184 : vector<32x128xf32>
    %cst_74 = arith.constant 0.707106769 : f32
    %187 = vector.broadcast %cst_74 : f32 to vector<32x128xf32>
    %188 = arith.mulf %184, %187 : vector<32x128xf32>
    %189 = math.erf %188 : vector<32x128xf32>
    %cst_75 = arith.constant 1.000000e+00 : f32
    %190 = vector.broadcast %cst_75 : f32 to vector<32x128xf32>
    %191 = arith.addf %190, %189 : vector<32x128xf32>
    %192 = arith.mulf %186, %191 : vector<32x128xf32>
    %193 = arith.truncf %192 : vector<32x128xf32> to vector<32x128xbf16>
    %c0_76 = arith.constant 0 : index
    %c0_77 = arith.constant 0 : index
    %194 = vector.load %arg13[%c0_76, %c0_77] : memref<128x32xbf16, #tpu.memory_space<vmem>>, vector<128x32xbf16>
    %cst_78 = arith.constant dense<0.000000e+00> : vector<32x32xf32>
    %195 = tpu.matmul %193, %194, %cst_78 {dimension_numbers = #tpu.dot_dimension_numbers<[1], [0], [0], [1], [0, 0, 1, 1], [], []>} : vector<32x128xbf16>, vector<128x32xbf16>, vector<32x32xf32> -> vector<32x32xf32>
    %c0_79 = arith.constant 0 : index
    %c0_80 = arith.constant 0 : index
    %196 = vector.load %arg14[%c0_79, %c0_80] : memref<1x32xf32, #tpu.memory_space<vmem>>, vector<1x32xf32>
    %197 = vector.broadcast %196 : vector<1x32xf32> to vector<32x32xf32>
    %198 = arith.addf %195, %197 : vector<32x32xf32>
    %199 = arith.addf %154, %198 : vector<32x32xf32>
    %c0_81 = arith.constant 0 : index
    %c0_82 = arith.constant 0 : index
    %200 = vector.load %arg15[%c0_81, %c0_82] : memref<32x32xf32, #tpu.memory_space<vmem>>, vector<32x32xf32>
    tpu.vector_store %arg15[%c0_81, %c0_82], %199 {strides = array<i32>} : memref<32x32xf32, #tpu.memory_space<vmem>>, vector<32x32xf32>,
    return
  }
  func.func @transform_0(%arg0: i32) -> (i32, i32) {
    %c0_i32 = arith.constant 0 : i32
    %c0_i32_0 = arith.constant 0 : i32
    return %arg0, %c0_i32 : i32, i32
  }
  func.func @transform_1(%arg0: i32) -> (i32, i32) {
    %c0_i32 = arith.constant 0 : i32
    %c0_i32_0 = arith.constant 0 : i32
    %c0_i32_1 = arith.constant 0 : i32
    return %c0_i32, %c0_i32_0 : i32, i32
  }
  func.func @transform_2(%arg0: i32) -> (i32, i32) {
    %c0_i32 = arith.constant 0 : i32
    %c0_i32_0 = arith.constant 0 : i32
    %c0_i32_1 = arith.constant 0 : i32
    return %c0_i32, %c0_i32_0 : i32, i32
  }
  func.func @transform_3(%arg0: i32) -> (i32, i32) {
    %c0_i32 = arith.constant 0 : i32
    %c0_i32_0 = arith.constant 0 : i32
    %c0_i32_1 = arith.constant 0 : i32
    return %c0_i32, %c0_i32_0 : i32, i32
  }
  func.func @transform_4(%arg0: i32) -> (i32, i32) {
    %c0_i32 = arith.constant 0 : i32
    %c0_i32_0 = arith.constant 0 : i32
    %c0_i32_1 = arith.constant 0 : i32
    return %c0_i32, %c0_i32_0 : i32, i32
  }
  func.func @transform_5(%arg0: i32) -> (i32, i32, i32) {
    %c0_i32 = arith.constant 0 : i32
    %c0_i32_0 = arith.constant 0 : i32
    %c0_i32_1 = arith.constant 0 : i32
    %c0_i32_2 = arith.constant 0 : i32
    return %c0_i32, %c0_i32_0, %c0_i32_1 : i32, i32, i32
  }
  func.func @transform_6(%arg0: i32) -> (i32, i32) {
    %c0_i32 = arith.constant 0 : i32
    %c0_i32_0 = arith.constant 0 : i32
    %c0_i32_1 = arith.constant 0 : i32
    return %c0_i32, %c0_i32_0 : i32, i32
  }
  func.func @transform_7(%arg0: i32) -> (i32, i32, i32) {
    %c0_i32 = arith.constant 0 : i32
    %c0_i32_0 = arith.constant 0 : i32
    %c0_i32_1 = arith.constant 0 : i32
    %c0_i32_2 = arith.constant 0 : i32
    return %c0_i32, %c0_i32_0, %c0_i32_1 : i32, i32, i32
  }
  func.func @transform_8(%arg0: i32) -> (i32, i32) {
    %c0_i32 = arith.constant 0 : i32
    %c0_i32_0 = arith.constant 0 : i32
    %c0_i32_1 = arith.constant 0 : i32
    return %c0_i32, %c0_i32_0 : i32, i32
  }
  func.func @transform_9(%arg0: i32) -> (i32, i32) {
    %c0_i32 = arith.constant 0 : i32
    %c0_i32_0 = arith.constant 0 : i32
    %c0_i32_1 = arith.constant 0 : i32
    return %c0_i32, %c0_i32_0 : i32, i32
  }
  func.func @transform_10(%arg0: i32) -> (i32, i32) {
    %c0_i32 = arith.constant 0 : i32
    %c0_i32_0 = arith.constant 0 : i32
    %c0_i32_1 = arith.constant 0 : i32
    return %c0_i32, %c0_i32_0 : i32, i32
  }
  func.func @transform_11(%arg0: i32) -> (i32, i32) {
    %c0_i32 = arith.constant 0 : i32
    %c0_i32_0 = arith.constant 0 : i32
    %c0_i32_1 = arith.constant 0 : i32
    return %c0_i32, %c0_i32_0 : i32, i32
  }
  func.func @transform_12(%arg0: i32) -> (i32, i32) {
    %c0_i32 = arith.constant 0 : i32
    %c0_i32_0 = arith.constant 0 : i32
    %c0_i32_1 = arith.constant 0 : i32
    return %c0_i32, %c0_i32_0 : i32, i32
  }
  func.func @transform_13(%arg0: i32) -> (i32, i32) {
    %c0_i32 = arith.constant 0 : i32
    %c0_i32_0 = arith.constant 0 : i32
    %c0_i32_1 = arith.constant 0 : i32
    return %c0_i32, %c0_i32_0 : i32, i32
  }
  func.func @transform_14(%arg0: i32) -> (i32, i32) {
    %c0_i32 = arith.constant 0 : i32
    %c0_i32_0 = arith.constant 0 : i32
    return %arg0, %c0_i32 : i32, i32
  }
}

</mosaic_0001>

<bundles_post_ra>
// kernel: tpu_custom_call.1
= control target key start
LH: loop header
LB: loop body
LE: loop exit
PB: predicated region body
PF: predicated region fallthrough
CT: control target
= control target key end

     0   :  { %19 = vsyncpa [#allocation3], 0  ;;  %s3865_s0 = inlined_call_operand.vmem [shape: f32[32,32], index: 0, kind: input, shape index: {}]   ;;  %s3866_s1 = inlined_call_operand.vmem [shape: f32[1,32], index: 1, kind: input, shape index: {}]   ;;  %s3867_s2 = inlined_call_operand.vmem [shape: f32[1,32], index: 2, kind: input, shape index: {}]   ;;  %s3868_s3 = inlined_call_operand.vmem [shape: bf16[32,96], index: 3, kind: input, shape index: {}]   ;;  %s3869_s4 = inlined_call_operand.vmem [shape: f32[1,96], index: 4, kind: input, shape index: {}]   ;;  %s3870_s5 = inlined_call_operand.hbm [shape: bf16[4,8,32], index: 5, kind: input, shape index: {}]   ;;  %s3871_s6 = inlined_call_operand.vmem [shape: f32[1,32], index: 6, kind: input, shape index: {}]   ;;  %s3872_s7 = inlined_call_operand.vmem [shape: f32[4,8,8], index: 7, kind: input, shape index: {}]   ;;  %s3873_s8 = inlined_call_operand.vmem [shape: f32[1,32], index: 8, kind: input, shape index: {}]   ;;  %s3874_s9 = inlined_call_operand.hbm [shape: f32[1,32], index: 9, kind: input, shape index: {}]   ;;  %s3875_s10 = inlined_call_operand.hbm [shape: bf16[32,128], index: 10, kind: input, shape index: {}]   ;;  %s3876_s11 = inlined_call_operand.hbm [shape: f32[1,128], index: 11, kind: input, shape index: {}]   ;;  %s3877_s12 = inlined_call_operand.vmem [shape: bf16[128,32], index: 12, kind: input, shape index: {}]   ;;  %s3878_s13 = inlined_call_operand.vmem [shape: f32[1,32], index: 13, kind: input, shape index: {}]   ;;  %s3879_s14 = inlined_call_operand.hbm [shape: f32[32,32], index: 14, kind: output, shape index: {}]  }
   0x1   :  { %20 = vsyncpa [#allocation6], 0 }
   0x2   :  { %21 = vsyncpa [#allocation9], 0 }
   0x3   :  { %22 = vsyncpa [#allocation4], 0  ;;  %s3284_s29 = smov [#allocation5]   ;;  %s3285_s15 = smov [#allocation2]  }
   0x4   :  { %s57_s30 = sshll.u32 %s3284_s29, 4  ;;  %s38_s16 = sshll.u32 %s3285_s15, 4  ;;  %s58_s30 = int_to_ptr.vmem [resolvable:$true] %s57_s30  ;;  %s39_s16 = int_to_ptr.vmem [resolvable:$true] %s38_s16 }
   0x5   :  { %s3184_s17 = scalar_lea.vmem %s58_s30, 16  ;;  %s3188_s18 = scalar_lea.vmem %s58_s30, 32 }
   0x6   :  { %p3185_p0 = scmp.ne.s32.totalorder %s58_s30, %s3184_s17  ;;  %p3189_p1 = scmp.lt.s32.totalorder %s58_s30, %s58_s30 }
   0x7   :  { %p3190_p2 = scmp.lt.s32.totalorder %s3188_s18, %s3184_s17 }
   0x9   :  { %p3191_p3 = por %p3190_p2, %p3189_p1 }
   0xb   :  { %p3192_p4 = pnand %p3191_p3, %p3185_p0 }
   0xd   :  { %3195 = shalt.err (!%p3192_p4)
}
   0xe   :  { %60 = dma.hbm_to_vmem [thread:$0]  %s3874_s9, 16, %s58_s30, [#allocation6]  }
   0xf   :  { %s3204_s21 = scalar_lea.vmem %s39_s16, 256  ;;  %p3209_p6 = scmp.lt.s32.totalorder %s39_s16, %s39_s16 }
  0x10   :  { %p3205_p5 = scmp.ne.s32.totalorder %s39_s16, %s3204_s21  ;;  %p3210_p7 = scmp.lt.s32.totalorder %s3204_s21, %s3204_s21 }
  0x12   :  { %p3211_p8 = por %p3210_p7, %p3209_p6 }
  0x14   :  { %p3212_p9 = pnand %p3211_p8, %p3205_p5 }
  0x16   :  { %3215 = shalt.err (!%p3212_p9)
}
  0x17   :  { %s3286_s22 = smov 64   ;;  %s3287_s23 = smov 4  }
  0x18   :  { %44 = dma.hbm_to_vmem [thread:$0]  %s3870_s5, 256, %s39_s16, [#allocation3], %s3286_s22, %s3286_s22, %s3287_s23  }
  0x19   :  { %s3288_s26 = smov [#allocation7]   ;;  %s3289_s28 = smov [#allocation8]  }
  0x1a   :  { %s66_s27 = sshll.u32 %s3288_s26, 4  ;;  %s79_s29 = sshll.u32 %s3289_s28, 4  ;;  %s67_s27 = int_to_ptr.vmem [resolvable:$true] %s66_s27  ;;  %s80_s29 = int_to_ptr.vmem [resolvable:$true] %s79_s29 }
  0x1b   :  { %s3224_s9 = scalar_lea.vmem %s67_s27, 256  ;;  %p3229_p11 = scmp.lt.s32.totalorder %s67_s27, %s67_s27 }
  0x1c   :  { %p3225_p10 = scmp.ne.s32.totalorder %s67_s27, %s3224_s9  ;;  %p3230_p12 = scmp.lt.s32.totalorder %s3224_s9, %s3224_s9 }
  0x1e   :  { %p3231_p13 = por %p3230_p12, %p3229_p11 }
  0x20   :  { %p3232_p0 = pnand %p3231_p13, %p3225_p10 }
  0x22   :  { %3235 = shalt.err (!%p3232_p0)
}
  0x23   :  { %72 = dma.hbm_to_vmem [thread:$0]  %s3875_s10, 256, %s67_s27, [#allocation6], %s3286_s22, %s3286_s22, %s3287_s23  }
  0x24   :  { %s3244_s5 = scalar_lea.vmem %s80_s29, 16  ;;  %s3248_s16 = scalar_lea.vmem %s80_s29, 32 }
  0x25   :  { %p3245_p1 = scmp.ne.s32.totalorder %s80_s29, %s3244_s5  ;;  %p3249_p2 = scmp.lt.s32.totalorder %s80_s29, %s80_s29 }
  0x26   :  { %p3250_p3 = scmp.lt.s32.totalorder %s3248_s16, %s3244_s5 }
  0x28   :  { %p3251_p4 = por %p3250_p3, %p3249_p2 }
  0x2a   :  { %p3252_p5 = pnand %p3251_p4, %p3245_p1 }
  0x2c   :  { %3255 = shalt.err (!%p3252_p5)
}
  0x2d   :  { %82 = dma.hbm_to_vmem [thread:$0]  %s3876_s11, 16, %s80_s29, [#allocation9]  }
  0x2e   :  { %3276 = dma.done.wait [#allocation3], 256  }
  0x2f   :  { %3277 = vsyncadd [#allocation3], 4294967040 }
  0x30   :  { %3278 = dma.done.wait [#allocation6], 272  }
  0x31   :  { %3279 = vsyncadd [#allocation6], 4294967024 }
  0x32   :  { %3280 = dma.done.wait [#allocation9], 16  }
  0x33   :  { %3281 = vsyncadd [#allocation9], 4294967280  ;;  %vm104_vm0 = vcmask 261120   ;;  %v100_v0 = vld [vmem:[%s3865_s0] sm:$0xff]  ;;  %v102_v1 = vld [vmem:[%s3865_s0 + $0x10] sm:$0xff]  ;;  %v3290_v62 = vmov 0.0  }
  0x34   :  { %v101_v2 = vld [vmem:[%s3865_s0 + $0x8] sm:$0xff]  ;;  %v105_v3 = vsel %vm104_vm0, %v100_v0, 0.0  ;;  %v111_v4 = vsel %vm104_vm0, %v102_v1, 0.0  ;;  %v103_v5 = vld [vmem:[%s3865_s0 + $0x18] sm:$0xff]  ;;  %v3073_v29 = vld [vmem:[%s3868_s3] sm:$0xff]   ;;  %2821 = vmatprep.subr.bf16.mxu0 %v3290_v62  ;;  %vm3291_vm1 = vmmov 0  }
  0x35   :  { %106 = vadd.xlane.f32.xlu0 %v105_v3  ;;  %112 = vadd.xlane.f32.xlu1 %v111_v4  ;;  %v108_v6 = vsel %vm104_vm0, %v101_v2, 0.0  ;;  %v114_v7 = vsel %vm104_vm0, %v103_v5, 0.0  ;;  %v3072_v28 = vld [vmem:[%s3868_s3 + $0x8] sm:$0xff]   ;;  %v2634_v44 = vld [vmem:[%s3866_s1] ss:$0 sm:$0xff]  ;;  %s3292_s5 = smov 96  }
  0x36   :  { %2795 = vmatprep.subr.bf16.mxu1 %v3072_v28  ;;  %v2635_v49 = vld [vmem:[%s3867_s2] ss:$0 sm:$0xff]  ;;  %2823 = vmatprep.mubr.msk.bf16.mxu0 %vm3291_vm1, %v3290_v62  ;;  %vm276_vm2 = vcmask 64512   ;;  %vm523_vm3 = vcmask 1043456   ;;  %s3293_s17 = smov 88   ;;  %s3294_s18 = smov 120  }
  0x37   :  { %2796 = vmatpush3.bf16.msra.mxu1 %v3072_v28  ;;  %v272_v28 = vld [vmem:[%s3872_s7] sm:$0xff]  ;;  %s3295_s19 = smov 56   ;;  %s3296_s20 = smov 80  }
  0x38   :  { %2797 = vmatprep.subr.bf16.mxu1 %v3073_v29  ;;  %s3297_s21 = smov 112   ;;  %s3298_s11 = smov 48  }
  0x39   :  { %109 = vadd.xlane.f32.xlu0 %v108_v6  ;;  %115 = vadd.xlane.f32.xlu1 %v114_v7  ;;  %s3299_s25 = smov 72   ;;  %s3300_s26 = smov 104  }
  0x3a   :  { %s3302_s3 = smov [#allocation10]  }
  0x3b   :  { %2798 = vmatpush3.bf16.msra.mxu1 %v3073_v29  ;;  %s2620_s9 = sshll.u32 %s3302_s3, 4  ;;  %s2621_s9 = int_to_ptr.vmem [resolvable:$true] %s2620_s9 }
  0x3c   :  { %2803 = vmatprep.subr.bf16.mxu1 %v3290_v62  ;;  %p3261_p7 = scmp.lt.s32.totalorder %s2621_s9, %s2621_s9 }
  0xbe   :  { %v107_v8 = vpop.xlane.xlu0 %106  ;;  %v113_v9 = vpop.xlane.xlu1 %112 }
  0xbf   :  { %v118_v10 = vmul.f32 0.03125, %v107_v8  ;;  %v120_v11 = vmul.f32 0.03125, %v113_v9 }
  0xc1   :  { %v122_v12 = vsub.f32 %v100_v0, %v118_v10  ;;  %v124_v13 = vsub.f32 %v102_v1, %v120_v11  ;;  %v2636_v0 = vld [vmem:[%s3869_s4] ss:$0 sm:$0xff] }
  0xc2   :  { %v110_v14 = vpop.xlane.xlu0 %109  ;;  %v116_v15 = vpop.xlane.xlu1 %115 }
  0xc3   :  { %v119_v16 = vmul.f32 0.03125, %v110_v14  ;;  %v121_v17 = vmul.f32 0.03125, %v116_v15  ;;  %v126_v18 = vmul.f32 %v122_v12, %v122_v12  ;;  %v128_v19 = vmul.f32 %v124_v13, %v124_v13 }
  0xc5   :  { %v123_v20 = vsub.f32 %v101_v2, %v119_v16  ;;  %v125_v21 = vsub.f32 %v103_v5, %v121_v17  ;;  %v130_v22 = vsel %vm104_vm0, %v126_v18, 0.0  ;;  %v136_v23 = vsel %vm104_vm0, %v128_v19, 0.0 }
  0xc6   :  { %131 = vadd.xlane.f32.xlu0 %v130_v22 }
  0xc7   :  { %v127_v24 = vmul.f32 %v123_v20, %v123_v20  ;;  %v129_v25 = vmul.f32 %v125_v21, %v125_v21 }
  0xc9   :  { %v133_v26 = vsel %vm104_vm0, %v127_v24, 0.0  ;;  %v139_v27 = vsel %vm104_vm0, %v129_v25, 0.0 }
  0xca   :  { %137 = vadd.xlane.f32.xlu0 %v136_v23  ;;  %134 = vadd.xlane.f32.xlu1 %v133_v26 }
  0xce   :  { %140 = vadd.xlane.f32.xlu1 %v139_v27 }
 0x14f   :  { %v132_v30 = vpop.xlane.xlu0 %131 }
 0x150   :  { %v142_v31 = vmul.f32 0.03125, %v132_v30 }
 0x152   :  { %v146_v32 = vadd.f32 1e-05, %v142_v31 }
 0x153   :  { %v135_v33 = vpop.xlane.xlu1 %134  ;;  %v138_v34 = vpop.xlane.xlu0 %137 }
 0x154   :  { %3084 = vrsqrt.f32 %v146_v32  ;;  %v143_v35 = vmul.f32 0.03125, %v135_v33  ;;  %v144_v36 = vmul.f32 0.03125, %v138_v34 }
 0x156   :  { %v147_v37 = vadd.f32 1e-05, %v143_v35  ;;  %v148_v38 = vadd.f32 1e-05, %v144_v36 }
 0x157   :  { %v141_v39 = vpop.xlane.xlu1 %140 }
 0x158   :  { %3086 = vrsqrt.f32 %v147_v37  ;;  %v145_v40 = vmul.f32 0.03125, %v141_v39 }
 0x159   :  { %3088 = vrsqrt.f32 %v148_v38 }
 0x15a   :  { %v149_v41 = vadd.f32 1e-05, %v145_v40 }
 0x15c   :  { %3090 = vrsqrt.f32 %v149_v41 }
 0x161   :  { %v3085_v42 = vpop.eup %3084 }
 0x162   :  { %v154_v43 = vmul.f32 %v3085_v42, %v122_v12 }
 0x164   :  { %v165_v48 = vmul.f32 %v2634_v44, %v154_v43 }
 0x165   :  { %v3087_v45 = vpop.eup %3086 }
 0x166   :  { %v3089_v46 = vpop.eup %3088  ;;  %v155_v47 = vmul.f32 %v3087_v45, %v123_v20  ;;  %v176_v53 = vadd.f32 %v2635_v49, %v165_v48 }
 0x167   :  { %v156_v50 = vmul.f32 %v3089_v46, %v124_v13 }
 0x168   :  { %v166_v51 = vmul.f32 %v2634_v44, %v155_v47 }
 0x169   :  { %v3091_v52 = vpop.eup %3090  ;;  %v167_v56 = vmul.f32 %v2634_v44, %v156_v50 }
 0x16a   :  { %v177_v54 = vadd.f32 %v2635_v49, %v166_v51  ;;  %v157_v55 = vmul.f32 %v3091_v52, %v125_v21 }
 0x16b   :  { %v178_v59 = vadd.f32 %v2635_v49, %v167_v56 }
 0x16c   :  { %v180_v57 = vpack.c.bf16 %v177_v54, %v176_v53  ;;  %v168_v58 = vmul.f32 %v2634_v44, %v157_v55 }
 0x16e   :  { %2799 = vmatprep.mubr.msk.bf16.mxu1 %vm104_vm0, %v180_v57  ;;  %v179_v60 = vadd.f32 %v2635_v49, %v168_v58 }
 0x170   :  { %v181_v61 = vpack.c.bf16 %v179_v60, %v178_v59 }
 0x172   :  { %2800 = vmatmul.mubr.msk.bf16.vlgmr.msra.gmra.mxu1 %vm104_vm0, %v181_v61 }
 0x173   :  { %2805 = vmatprep.mubr.msk.bf16.mxu1 %vm3291_vm1, %v3290_v62 }
 0x232   :  { %v2801_v63 = vpop.f32.mrf.mxu1 }
 0x233   :  { %v254_v7 = vadd.f32 %v2801_v63, %v2636_v0 }
 0x234   :  { %v245_v1 = vpop.f32.mrf.mxu1 }
 0x235   :  { %v246_v2 = vadd.f32 %v2636_v0, %v245_v1  ;;  %v3445_v9 = vpack.c.bf16 %v254_v7, %v254_v7  ;;  %v262_v25 = vmul.f32 0.35355338, %v254_v7 }
 0x236   :  { %v2802_v3 = vpop.f32.mrf.mxu1 }
 0x237   :  { %v3439_v4 = vpack.c.bf16 %v246_v2, %v246_v2  ;;  %v257_v10 = vadd.f32 %v2802_v3, %v2636_v0  ;;  %v260_v14 = vmul.f32 0.35355338, %v246_v2  ;;  %v3477_v27 = vpack.c.bf16 %v262_v25, %v262_v25 }
 0x238   :  { %v248_v5 = vpop.f32.mrf.mxu1 }
 0x239   :  { %v249_v6 = vadd.f32 %v2636_v0, %v248_v5  ;;  %274 = vrot.lane.b32.xlu0 %v3439_v4, %s3292_s5  ;;  %v3448_v11 = vpack.c.bf16 %v257_v10, %v257_v10  ;;  %v3453_v16 = vpack.c.bf16 %v260_v14, %v260_v14  ;;  %v263_v22 = vmul.f32 0.35355338, %v257_v10 }
 0x23b   :  { %v3442_v8 = vpack.c.bf16 %v249_v6, %v249_v6  ;;  %v261_v19 = vmul.f32 0.35355338, %v249_v6  ;;  %v3470_v26 = vpack.c.bf16 %v263_v22, %v263_v22 }
 0x23d   :  { %324 = vrot.lane.b32.xlu1 %v3442_v8, %s3292_s5  ;;  %v3462_v23 = vpack.c.bf16 %v261_v19, %v261_v19 }
 0x241   :  { %373 = vrot.lane.b32.xlu1 %v3445_v9, %s3292_s5 }
 0x245   :  { %422 = vrot.lane.b32.xlu1 %v3448_v11, %s3292_s5 }
 0x2ab   :  { %v275_v12 = vpop.permute.xlu0 %274 }
 0x2ac   :  { %v281_v13 = vsel %vm276_vm2, %v275_v12, 0 }
 0x2ad   :  { %2804 = vmatpush3.bf16.xpose.msra.mxu1 %v281_v13 }
 0x2ae   :  { %2809 = vmatprep.subr.bf16.mxu1 %v3290_v62 }
 0x2af   :  { %v325_v15 = vpop.permute.xlu1 %324 }
 0x2b0   :  { %v330_v18 = vsel %vm276_vm2, %v325_v15, 0 }
 0x2b3   :  { %v374_v17 = vpop.permute.xlu1 %373 }
 0x2b4   :  { %2806 = vmatmul.mubr.msk.bf16.vlgmr.msra.gmra.mxu1 %vm276_vm2, %v3453_v16  ;;  %v379_v24 = vsel %vm276_vm2, %v374_v17, 0 }
 0x2b5   :  { %2810 = vmatpush3.bf16.xpose.msra.mxu1 %v330_v18  ;;  %2811 = vmatprep.mubr.msk.bf16.mxu1 %vm3291_vm1, %v3290_v62 }
 0x2b6   :  { %2815 = vmatprep.subr.bf16.mxu1 %v3290_v62 }
 0x2b7   :  { %v423_v20 = vpop.permute.xlu1 %422 }
 0x2b8   :  { %v428_v21 = vsel %vm276_vm2, %v423_v20, 0 }
 0x2b9   :  { %2822 = vmatpush3.bf16.xpose.msra.mxu0 %v428_v21 }
 0x2ba   :  { %2833 = vmatprep.subr.bf16.mxu0 %v3290_v62 }
 0x2bc   :  { %2812 = vmatmul.mubr.msk.bf16.vlgmr.msra.gmra.mxu1 %vm276_vm2, %v3462_v23 }
 0x2bd   :  { %2816 = vmatpush3.bf16.xpose.msra.mxu1 %v379_v24  ;;  %2817 = vmatprep.mubr.msk.bf16.mxu1 %vm3291_vm1, %v3290_v62 }
 0x2be   :  { %2827 = vmatprep.subr.bf16.mxu1 %v3290_v62 }
 0x2c0   :  { %2824 = vmatmul.mubr.msk.bf16.vlgmr.msra.gmra.mxu0 %vm276_vm2, %v3470_v26 }
 0x2c1   :  { %2835 = vmatprep.mubr.msk.bf16.mxu0 %vm3291_vm1, %v3290_v62 }
 0x2c4   :  { %2818 = vmatmul.mubr.msk.bf16.vlgmr.msra.gmra.mxu1 %vm276_vm2, %v3477_v27 }
 0x2c5   :  { %2829 = vmatprep.mubr.msk.bf16.mxu1 %vm3291_vm1, %v3290_v62 }
 0x374   :  { %v317_v29 = vpop.f32.mrf.mxu1 }
 0x375   :  { %v318_v30 = vadd.f32 %v317_v29, %v272_v28 }
 0x376   :  { %v2807_v31 = vpop.f32.mrf.mxu1 }
 0x377   :  { %v470_v32 = vsel %vm276_vm2, %v318_v30, -inf }
 0x378   :  { %471 = vmax.xlane.f32.xlu0 %v470_v32  ;;  %v320_v33 = vpop.f32.mrf.mxu1 }
 0x37a   :  { %v2808_v34 = vpop.f32.mrf.mxu1 }
 0x37c   :  { %v366_v35 = vpop.f32.mrf.mxu1 }
 0x37d   :  { %v367_v36 = vadd.f32 %v366_v35, %v272_v28 }
 0x37e   :  { %v2813_v37 = vpop.f32.mrf.mxu1 }
 0x37f   :  { %v473_v38 = vsel %vm276_vm2, %v367_v36, -inf }
 0x380   :  { %v464_v39 = vpop.f32.mrf.mxu0  ;;  %474 = vmax.xlane.f32.xlu1 %v473_v38  ;;  %v369_v40 = vpop.f32.mrf.mxu1 }
 0x381   :  { %v465_v48 = vadd.f32 %v464_v39, %v272_v28 }
 0x382   :  { %v2814_v41 = vpop.f32.mrf.mxu1  ;;  %v2825_v42 = vpop.f32.mrf.mxu0 }
 0x383   :  { %v479_v52 = vsel %vm276_vm2, %v465_v48, -inf }
 0x384   :  { %v415_v43 = vpop.f32.mrf.mxu1  ;;  %v467_v44 = vpop.f32.mrf.mxu0 }
 0x385   :  { %v416_v45 = vadd.f32 %v415_v43, %v272_v28 }
 0x386   :  { %v2819_v46 = vpop.f32.mrf.mxu1  ;;  %v2826_v47 = vpop.f32.mrf.mxu0 }
 0x387   :  { %v476_v49 = vsel %vm276_vm2, %v416_v45, -inf }
 0x388   :  { %477 = vmax.xlane.f32.xlu0 %v476_v49  ;;  %v418_v50 = vpop.f32.mrf.mxu1 }
 0x38a   :  { %v2820_v51 = vpop.f32.mrf.mxu1 }
 0x38c   :  { %480 = vmax.xlane.f32.xlu0 %v479_v52 }
 0x391   :  { %567 = vrot.lane.b32.xlu1 %v3442_v8, %s3286_s22 }
 0x395   :  { %615 = vrot.lane.b32.xlu1 %v3445_v9, %s3286_s22 }
 0x401   :  { %v472_v53 = vpop.xlane.xlu0 %471 }
 0x402   :  { %v482_v54 = vsub.f32 %v318_v30, %v472_v53 }
 0x404   :  { %v486_v55 = vmul.f32 1.442695, %v482_v54 }
 0x406   :  { %3092 = vpow2.f32 %v486_v55 }
 0x409   :  { %v475_v56 = vpop.xlane.xlu1 %474 }
 0x40a   :  { %v483_v61 = vsub.f32 %v367_v36, %v475_v56 }
 0x40c   :  { %v488_v2 = vmul.f32 1.442695, %v483_v61 }
 0x40d   :  { %v568_v57 = vpop.permute.xlu1 %567 }
 0x40e   :  { %v573_v58 = vsel %vm523_vm3, %v568_v57, 0 }
 0x40f   :  { %2834 = vmatpush3.bf16.msra.mxu0 %v573_v58 }
 0x410   :  { %2845 = vmatprep.subr.bf16.mxu0 %v3290_v62 }
 0x411   :  { %v478_v59 = vpop.xlane.xlu0 %477  ;;  %v616_v22 = vpop.permute.xlu1 %615 }
 0x412   :  { %v484_v12 = vsub.f32 %v416_v45, %v478_v59  ;;  %v621_v25 = vsel %vm523_vm3, %v616_v22, 0 }
 0x413   :  { %v3093_v60 = vpop.eup %3092 }
 0x414   :  { %v494_v63 = vsel %vm276_vm2, %v3093_v60, 0.0  ;;  %v490_v13 = vmul.f32 1.442695, %v484_v12 }
 0x415   :  { %495 = vadd.xlane.f32.xlu0 %v494_v63  ;;  %v481_v0 = vpop.xlane.xlu0 %480 }
 0x416   :  { %v485_v1 = vsub.f32 %v465_v48, %v481_v0 }
 0x418   :  { %v492_v3 = vmul.f32 1.442695, %v485_v1 }
 0x41a   :  { %3094 = vpow2.f32 %v492_v3 }
 0x41b   :  { %3096 = vpow2.f32 %v488_v2 }
 0x41c   :  { %3098 = vpow2.f32 %v490_v13 }
 0x427   :  { %v3095_v5 = vpop.eup %3094 }
 0x428   :  { %v503_v6 = vsel %vm276_vm2, %v3095_v5, 0.0  ;;  %v3097_v7 = vpop.eup %3096 }
 0x429   :  { %504 = vadd.xlane.f32.xlu1 %v503_v6  ;;  %v497_v10 = vsel %vm276_vm2, %v3097_v7, 0.0  ;;  %v3099_v14 = vpop.eup %3098 }
 0x42a   :  { %v500_v15 = vsel %vm276_vm2, %v3099_v14, 0.0 }
 0x42b   :  { %518 = vrot.lane.b32.xlu0 %v3439_v4, %s3286_s22 }
 0x42d   :  { %498 = vadd.xlane.f32.xlu1 %v497_v10 }
 0x43e   :  { %663 = vrot.lane.b32.xlu1 %v3448_v11, %s3286_s22 }
 0x442   :  { %770 = vrot.lane.b32.xlu1 %v3442_v8, %s3293_s17 }
 0x446   :  { %768 = vrot.lane.b32.xlu1 %v3462_v23, %s3294_s18 }
 0x44a   :  { %501 = vadd.xlane.f32.xlu0 %v500_v15  ;;  %872 = vrot.lane.b32.xlu1 %v3448_v11, %s3293_s17 }
 0x44e   :  { %870 = vrot.lane.b32.xlu1 %v3470_v26, %s3294_s18 }
 0x460   :  { %719 = vrot.lane.b32.xlu0 %v3439_v4, %s3293_s17 }
 0x464   :  { %717 = vrot.lane.b32.xlu0 %v3453_v16, %s3294_s18 }
 0x468   :  { %821 = vrot.lane.b32.xlu0 %v3445_v9, %s3293_s17 }
 0x46c   :  { %819 = vrot.lane.b32.xlu0 %v3477_v27, %s3294_s18 }
 0x49e   :  { %v496_v17 = vpop.xlane.xlu0 %495 }
 0x49f   :  { %3100 = vrcp.f32 %v496_v17 }
 0x4a2   :  { %v519_v18 = vpop.permute.xlu0 %518 }
 0x4a3   :  { %v525_v19 = vsel %vm523_vm3, %v519_v18, 0 }
 0x4a4   :  { %2828 = vmatpush3.bf16.msra.mxu1 %v525_v19 }
 0x4a5   :  { %2839 = vmatprep.subr.bf16.mxu1 %v3290_v62 }
 0x4ac   :  { %v3101_v20 = vpop.eup %3100 }
 0x4ad   :  { %v510_v21 = vmul.f32 %v3101_v20, %v3093_v60 }
 0x4af   :  { %v514_v24 = vpack.c.bf16 %v510_v21, %v510_v21 }
 0x4b1   :  { %2830 = vmatmul.mubr.msk.bf16.vlgmr.msra.gmra.mxu1 %vm276_vm2, %v514_v24 }
 0x4b2   :  { %2840 = vmatpush3.bf16.msra.mxu1 %v621_v25  ;;  %v505_v28 = vpop.xlane.xlu1 %504  ;;  %2841 = vmatprep.mubr.msk.bf16.mxu1 %vm3291_vm1, %v3290_v62 }
 0x4b3   :  { %2851 = vmatprep.subr.bf16.mxu1 %v3290_v62 }
 0x4b6   :  { %v499_v29 = vpop.xlane.xlu1 %498 }
 0x4b7   :  { %3102 = vrcp.f32 %v499_v29 }
 0x4b8   :  { %3104 = vrcp.f32 %v505_v28 }
 0x4ba   :  { %v664_v31 = vpop.permute.xlu1 %663 }
 0x4bb   :  { %v669_v35 = vsel %vm523_vm3, %v664_v31, 0 }
 0x4be   :  { %v771_v36 = vpop.permute.xlu1 %770 }
 0x4bf   :  { %v776_v40 = vsel %vm276_vm2, %v771_v36, 0 }
 0x4c2   :  { %v769_v39 = vpop.permute.xlu1 %768 }
 0x4c4   :  { %v3103_v30 = vpop.eup %3102 }
 0x4c5   :  { %v511_v32 = vmul.f32 %v3103_v30, %v3097_v7  ;;  %v3105_v34 = vpop.eup %3104 }
 0x4c6   :  { %v513_v37 = vmul.f32 %v3105_v34, %v3095_v5  ;;  %v873_v42 = vpop.permute.xlu1 %872  ;;  %v2649_v5 = vld [vmem:[%s3872_s7 + $0x8] sm:$0xff] }
 0x4c7   :  { %v515_v33 = vpack.c.bf16 %v511_v32, %v511_v32  ;;  %v878_v43 = vsel %vm276_vm2, %v873_v42, 0 }
 0x4c8   :  { %v517_v38 = vpack.c.bf16 %v513_v37, %v513_v37 }
 0x4c9   :  { %2836 = vmatmul.mubr.msk.bf16.vlgmr.msra.gmra.mxu0 %vm276_vm2, %v515_v33 }
 0x4ca   :  { %2846 = vmatpush3.bf16.msra.mxu0 %v669_v35  ;;  %2847 = vmatprep.mubr.msk.bf16.mxu0 %vm3291_vm1, %v3290_v62  ;;  %v871_v45 = vpop.permute.xlu1 %870 }
 0x4cb   :  { %2857 = vmatprep.subr.bf16.mxu0 %v3290_v62 }
 0x4d1   :  { %2848 = vmatmul.mubr.msk.bf16.vlgmr.msra.gmra.mxu0 %vm276_vm2, %v517_v38 }
 0x4d2   :  { %2858 = vmatpush3.bf16.xpose.msra.mxu0 %v776_v40  ;;  %2859 = vmatprep.mubr.msk.bf16.mxu0 %vm3291_vm1, %v3290_v62 }
 0x4d3   :  { %v502_v41 = vpop.xlane.xlu0 %501  ;;  %2869 = vmatprep.subr.bf16.mxu0 %v3290_v62 }
 0x4d4   :  { %3106 = vrcp.f32 %v502_v41 }
 0x4d7   :  { %v720_v44 = vpop.permute.xlu0 %719 }
 0x4d8   :  { %v725_v50 = vsel %vm276_vm2, %v720_v44, 0 }
 0x4d9   :  { %2860 = vmatmul.mubr.msk.bf16.vlgmr.msra.gmra.mxu0 %vm276_vm2, %v769_v39 }
 0x4da   :  { %2870 = vmatpush3.bf16.xpose.msra.mxu0 %v878_v43  ;;  %2871 = vmatprep.mubr.msk.bf16.mxu0 %vm3291_vm1, %v3290_v62 }
 0x4db   :  { %2881 = vmatprep.subr.bf16.mxu0 %v3290_v62  ;;  %v718_v49 = vpop.permute.xlu0 %717 }
 0x4df   :  { %v822_v51 = vpop.permute.xlu0 %821 }
 0x4e0   :  { %v827_v52 = vsel %vm276_vm2, %v822_v51, 0 }
 0x4e1   :  { %v3107_v46 = vpop.eup %3106  ;;  %2872 = vmatmul.mubr.msk.bf16.vlgmr.msra.gmra.mxu0 %vm276_vm2, %v871_v45 }
 0x4e2   :  { %v512_v47 = vmul.f32 %v3107_v46, %v3099_v14  ;;  %2883 = vmatprep.mubr.msk.bf16.mxu0 %vm3291_vm1, %v3290_v62 }
 0x4e3   :  { %v820_v53 = vpop.permute.xlu0 %819 }
 0x4e4   :  { %v516_v48 = vpack.c.bf16 %v512_v47, %v512_v47 }
 0x4e6   :  { %2842 = vmatmul.mubr.msk.bf16.vlgmr.msra.gmra.mxu1 %vm276_vm2, %v516_v48 }
 0x4e7   :  { %2852 = vmatpush3.bf16.xpose.msra.mxu1 %v725_v50  ;;  %2853 = vmatprep.mubr.msk.bf16.mxu1 %vm3291_vm1, %v3290_v62 }
 0x4e8   :  { %2863 = vmatprep.subr.bf16.mxu1 %v3290_v62 }
 0x4ee   :  { %2854 = vmatmul.mubr.msk.bf16.vlgmr.msra.gmra.mxu1 %vm276_vm2, %v718_v49 }
 0x4ef   :  { %2864 = vmatpush3.bf16.xpose.msra.mxu1 %v827_v52  ;;  %2865 = vmatprep.mubr.msk.bf16.mxu1 %vm3291_vm1, %v3290_v62 }
 0x4f0   :  { %2875 = vmatprep.subr.bf16.mxu1 %v3290_v62 }
 0x4f6   :  { %2866 = vmatmul.mubr.msk.bf16.vlgmr.msra.gmra.mxu1 %vm276_vm2, %v820_v53 }
 0x4f7   :  { %2877 = vmatprep.mubr.msk.bf16.mxu1 %vm3291_vm1, %v3290_v62 }
 0x571   :  { %v3550_v54 = vpop.f32.mrf.mxu1 }
 0x573   :  { %v2831_v55 = vpop.f32.mrf.mxu1 }
 0x575   :  { %v564_v56 = vpop.f32.mrf.mxu1 }
 0x577   :  { %v2832_v57 = vpop.f32.mrf.mxu1 }
 0x589   :  { %v3552_v58 = vpop.f32.mrf.mxu0 }
 0x58a   :  { %v711_v59 = vpack.c.bf16 %v3552_v58, %v3550_v54 }
 0x58b   :  { %v2837_v60 = vpop.f32.mrf.mxu0 }
 0x58d   :  { %v612_v61 = vpop.f32.mrf.mxu0 }
 0x58f   :  { %v2838_v63 = vpop.f32.mrf.mxu0 }
 0x591   :  { %v3556_v0 = vpop.f32.mrf.mxu0 }
 0x593   :  { %v2849_v1 = vpop.f32.mrf.mxu0 }
 0x595   :  { %v708_v2 = vpop.f32.mrf.mxu0 }
 0x597   :  { %v2850_v3 = vpop.f32.mrf.mxu0 }
 0x599   :  { %v812_v6 = vpop.f32.mrf.mxu0 }
 0x59a   :  { %v813_v7 = vadd.f32 %v2649_v5, %v812_v6 }
 0x59b   :  { %v2861_v10 = vpop.f32.mrf.mxu0 }
 0x59c   :  { %v923_v12 = vsel %vm276_vm2, %v813_v7, -inf }
 0x59d   :  { %924 = vmax.xlane.f32.xlu1 %v923_v12  ;;  %v815_v13 = vpop.f32.mrf.mxu0 }
 0x59f   :  { %v2862_v14 = vpop.f32.mrf.mxu0 }
 0x5a1   :  { %v914_v15 = vpop.f32.mrf.mxu0 }
 0x5a2   :  { %v915_v37 = vadd.f32 %v2649_v5, %v914_v15 }
 0x5a3   :  { %v2873_v17 = vpop.f32.mrf.mxu0 }
 0x5a4   :  { %v929_v41 = vsel %vm276_vm2, %v915_v37, -inf }
 0x5a5   :  { %v917_v18 = vpop.f32.mrf.mxu0 }
 0x5a6   :  { %v3562_v19 = vpop.f32.mrf.mxu1 }
 0x5a7   :  { %v712_v20 = vpack.c.bf16 %v3556_v0, %v3562_v19  ;;  %v2874_v21 = vpop.f32.mrf.mxu0  ;;  %v1163_v0 = vld [vmem:[#allocation2 + $0x4] sm:$0xf] }
 0x5a8   :  { %v2843_v22 = vpop.f32.mrf.mxu1  ;;  %v1171_v19 = vsel %vm523_vm3, %v1163_v0, 0 }
 0x5aa   :  { %v660_v24 = vpop.f32.mrf.mxu1 }
 0x5ac   :  { %v2844_v25 = vpop.f32.mrf.mxu1 }
 0x5ae   :  { %v761_v28 = vpop.f32.mrf.mxu1 }
 0x5af   :  { %v762_v29 = vadd.f32 %v2649_v5, %v761_v28 }
 0x5b0   :  { %v2855_v30 = vpop.f32.mrf.mxu1 }
 0x5b1   :  { %v920_v31 = vsel %vm276_vm2, %v762_v29, -inf }
 0x5b2   :  { %921 = vmax.xlane.f32.xlu0 %v920_v31  ;;  %v764_v32 = vpop.f32.mrf.mxu1 }
 0x5b4   :  { %v2856_v33 = vpop.f32.mrf.mxu1 }
 0x5b5   :  { %v713_v33 = vld [vmem:[#allocation2] sm:$0xf] }
 0x5b6   :  { %v863_v34 = vpop.f32.mrf.mxu1 }
 0x5b7   :  { %v864_v35 = vadd.f32 %v2649_v5, %v863_v34 }
 0x5b8   :  { %v2867_v36 = vpop.f32.mrf.mxu1 }
 0x5b9   :  { %v926_v38 = vsel %vm276_vm2, %v864_v35, -inf }
 0x5ba   :  { %927 = vmax.xlane.f32.xlu0 %v926_v38  ;;  %v866_v39 = vpop.f32.mrf.mxu1  ;;  %v1229_v38 = vsel %vm523_vm3, %v713_v33, 0 }
 0x5bc   :  { %v2868_v40 = vpop.f32.mrf.mxu1 }
 0x5be   :  { %930 = vmax.xlane.f32.xlu0 %v929_v41 }
 0x626   :  { %v925_v42 = vpop.xlane.xlu1 %924 }
 0x627   :  { %v933_v43 = vsub.f32 %v813_v7, %v925_v42 }
 0x629   :  { %v938_v44 = vmul.f32 1.442695, %v933_v43 }
 0x62b   :  { %3108 = vpow2.f32 %v938_v44 }
 0x638   :  { %v3109_v45 = vpop.eup %3108 }
 0x639   :  { %v947_v46 = vsel %vm276_vm2, %v3109_v45, 0.0 }
 0x63a   :  { %948 = vadd.xlane.f32.xlu1 %v947_v46 }
 0x63b   :  { %v922_v47 = vpop.xlane.xlu0 %921 }
 0x63c   :  { %v932_v48 = vsub.f32 %v762_v29, %v922_v47 }
 0x63e   :  { %v936_v49 = vmul.f32 1.442695, %v932_v48 }
 0x640   :  { %3110 = vpow2.f32 %v936_v49 }
 0x643   :  { %v928_v50 = vpop.xlane.xlu0 %927 }
 0x644   :  { %v934_v51 = vsub.f32 %v864_v35, %v928_v50 }
 0x646   :  { %v940_v52 = vmul.f32 1.442695, %v934_v51 }
 0x647   :  { %v931_v60 = vpop.xlane.xlu0 %930 }
 0x648   :  { %3112 = vpow2.f32 %v940_v52  ;;  %v935_v61 = vsub.f32 %v915_v37, %v931_v60 }
 0x64a   :  { %v942_v63 = vmul.f32 1.442695, %v935_v61 }
 0x64b   :  { %1016 = vrot.lane.b32.xlu1 %v3442_v8, %s3295_s19 }
 0x64c   :  { %3114 = vpow2.f32 %v942_v63 }
 0x64d   :  { %v3111_v53 = vpop.eup %3110 }
 0x64e   :  { %v944_v55 = vsel %vm276_vm2, %v3111_v53, 0.0 }
 0x64f   :  { %1064 = vrot.lane.b32.xlu1 %v3445_v9, %s3295_s19  ;;  %945 = vadd.xlane.f32.xlu0 %v944_v55 }
 0x655   :  { %v3113_v56 = vpop.eup %3112 }
 0x656   :  { %v950_v57 = vsel %vm276_vm2, %v3113_v56, 0.0 }
 0x657   :  { %951 = vadd.xlane.f32.xlu0 %v950_v57 }
 0x659   :  { %v3115_v1 = vpop.eup %3114 }
 0x65a   :  { %v953_v2 = vsel %vm276_vm2, %v3115_v1, 0.0 }
 0x66d   :  { %968 = vrot.lane.b32.xlu0 %v3439_v4, %s3295_s19 }
 0x671   :  { %1284 = vrot.lane.b32.xlu0 %v3439_v4, %s3296_s20 }
 0x673   :  { %954 = vadd.xlane.f32.xlu1 %v953_v2 }
 0x675   :  { %1282 = vrot.lane.b32.xlu0 %v3453_v16, %s3297_s21 }
 0x679   :  { %1384 = vrot.lane.b32.xlu0 %v3445_v9, %s3296_s20 }
 0x67d   :  { %1382 = vrot.lane.b32.xlu0 %v3477_v27, %s3297_s21 }
 0x684   :  { %1112 = vrot.lane.b32.xlu1 %v3448_v11, %s3295_s19 }
 0x688   :  { %1334 = vrot.lane.b32.xlu1 %v3442_v8, %s3296_s20 }
 0x68c   :  { %1332 = vrot.lane.b32.xlu1 %v3462_v23, %s3297_s21 }
 0x690   :  { %1434 = vrot.lane.b32.xlu1 %v3448_v11, %s3296_s20 }
 0x694   :  { %1432 = vrot.lane.b32.xlu1 %v3470_v26, %s3297_s21 }
 0x6c3   :  { %v949_v3 = vpop.xlane.xlu1 %948 }
 0x6c4   :  { %3116 = vrcp.f32 %v949_v3 }
 0x6c7   :  { %v1017_v5 = vpop.permute.xlu1 %1016 }
 0x6c8   :  { %v1022_v6 = vsel %vm523_vm3, %v1017_v5, 0 }
 0x6c9   :  { %2882 = vmatpush3.bf16.msra.mxu0 %v1022_v6 }
 0x6ca   :  { %2893 = vmatprep.subr.bf16.mxu0 %v3290_v62 }
 0x6cb   :  { %v1065_v22 = vpop.permute.xlu1 %1064 }
 0x6cc   :  { %v1070_v25 = vsel %vm523_vm3, %v1065_v22, 0 }
 0x6d1   :  { %v3117_v7 = vpop.eup %3116 }
 0x6d2   :  { %v961_v10 = vmul.f32 %v3117_v7, %v3109_v45 }
 0x6d4   :  { %v965_v12 = vpack.c.bf16 %v961_v10, %v961_v10 }
 0x6d6   :  { %2884 = vmatmul.mubr.msk.bf16.vlgmr.msra.gmra.mxu0 %vm276_vm2, %v965_v12 }
 0x6d7   :  { %2895 = vmatprep.mubr.msk.bf16.mxu0 %vm3291_vm1, %v3290_v62 }
 0x6d8   :  { %v946_v13 = vpop.xlane.xlu0 %945 }
 0x6d9   :  { %3118 = vrcp.f32 %v946_v13  ;;  %v2662_v13 = vld [vmem:[%s3872_s7 + $0x10] sm:$0xff] }
 0x6e0   :  { %v952_v14 = vpop.xlane.xlu0 %951 }
 0x6e1   :  { %3120 = vrcp.f32 %v952_v14 }
 0x6e4   :  { %v969_v15 = vpop.permute.xlu0 %968 }
 0x6e5   :  { %v974_v17 = vsel %vm523_vm3, %v969_v15, 0 }
 0x6e6   :  { %v3119_v18 = vpop.eup %3118  ;;  %2876 = vmatpush3.bf16.msra.mxu1 %v974_v17 }
 0x6e7   :  { %2887 = vmatprep.subr.bf16.mxu1 %v3290_v62  ;;  %v960_v21 = vmul.f32 %v3119_v18, %v3111_v53 }
 0x6e8   :  { %v1285_v55 = vpop.permute.xlu0 %1284 }
 0x6e9   :  { %v964_v24 = vpack.c.bf16 %v960_v21, %v960_v21  ;;  %v1290_v63 = vsel %vm276_vm2, %v1285_v55, 0 }
 0x6eb   :  { %2878 = vmatmul.mubr.msk.bf16.vlgmr.msra.gmra.mxu1 %vm276_vm2, %v964_v24 }
 0x6ec   :  { %2888 = vmatpush3.bf16.msra.mxu1 %v1070_v25  ;;  %2889 = vmatprep.mubr.msk.bf16.mxu1 %vm3291_vm1, %v3290_v62  ;;  %v1283_v60 = vpop.permute.xlu0 %1282 }
 0x6ed   :  { %3047 = vmatprep.subr.msk.bf16.mxu1 %vm523_vm3, %v1163_v0 }
 0x6ee   :  { %v3121_v28 = vpop.eup %3120 }
 0x6ef   :  { %v962_v29 = vmul.f32 %v3121_v28, %v3113_v56 }
 0x6f0   :  { %v1385_v3 = vpop.permute.xlu0 %1384 }
 0x6f1   :  { %v966_v30 = vpack.c.bf16 %v962_v29, %v962_v29  ;;  %v1390_v7 = vsel %vm276_vm2, %v1385_v3, 0 }
 0x6f3   :  { %2890 = vmatmul.mubr.msk.bf16.vlgmr.msra.gmra.mxu1 %vm276_vm2, %v966_v30 }
 0x6f4   :  { %2900 = vmatpush3.bf16.msra.mxu1 %v1171_v19  ;;  %v1383_v17 = vpop.permute.xlu0 %1382 }
 0x6f5   :  { %2911 = vmatprep.subr.bf16.mxu1 %v3290_v62 }
 0x6fc   :  { %v955_v31 = vpop.xlane.xlu1 %954 }
 0x6fd   :  { %3122 = vrcp.f32 %v955_v31 }
 0x700   :  { %v1113_v32 = vpop.permute.xlu1 %1112 }
 0x701   :  { %v1118_v34 = vsel %vm523_vm3, %v1113_v32, 0 }
 0x702   :  { %2894 = vmatpush3.bf16.msra.mxu0 %v1118_v34 }
 0x703   :  { %3048 = vmatprep.subr.msk.bf16.mxu0 %vm523_vm3, %v713_v33 }
 0x704   :  { %v1335_v39 = vpop.permute.xlu1 %1334 }
 0x705   :  { %v1340_v41 = vsel %vm276_vm2, %v1335_v39, 0 }
 0x708   :  { %v1333_v40 = vpop.permute.xlu1 %1332 }
 0x70a   :  { %v3123_v35 = vpop.eup %3122 }
 0x70b   :  { %v963_v36 = vmul.f32 %v3123_v35, %v3115_v1 }
 0x70c   :  { %v1435_v54 = vpop.permute.xlu1 %1434 }
 0x70d   :  { %v967_v37 = vpack.c.bf16 %v963_v36, %v963_v36  ;;  %v1440_v58 = vsel %vm276_vm2, %v1435_v54, 0 }
 0x70f   :  { %2896 = vmatmul.mubr.msk.bf16.vlgmr.msra.gmra.mxu0 %vm276_vm2, %v967_v37 }
 0x710   :  { %2907 = vmatprep.mubr.msk.bf16.mxu0 %vm276_vm2, %v711_v59  ;;  %2906 = vmatpush3.bf16.msra.mxu0 %v1229_v38  ;;  %v1433_v59 = vpop.permute.xlu1 %1432 }
 0x711   :  { %2917 = vmatprep.subr.bf16.mxu0 %v3290_v62 }
 0x717   :  { %2908 = vmatmul.mubr.msk.bf16.vlgmr.msra.gmra.mxu0 %vm276_vm2, %v712_v20 }
 0x718   :  { %2918 = vmatpush3.bf16.xpose.msra.mxu0 %v1340_v41  ;;  %2919 = vmatprep.mubr.msk.bf16.mxu0 %vm3291_vm1, %v3290_v62 }
 0x719   :  { %2929 = vmatprep.subr.bf16.mxu0 %v3290_v62 }
 0x71f   :  { %2920 = vmatmul.mubr.msk.bf16.vlgmr.msra.gmra.mxu0 %vm276_vm2, %v1333_v40 }
 0x720   :  { %2930 = vmatpush3.bf16.xpose.msra.mxu0 %v1440_v58  ;;  %2931 = vmatprep.mubr.msk.bf16.mxu0 %vm3291_vm1, %v3290_v62 }
 0x721   :  { %2941 = vmatprep.subr.bf16.mxu0 %v3290_v62 }
 0x727   :  { %2932 = vmatmul.mubr.msk.bf16.vlgmr.msra.gmra.mxu0 %vm276_vm2, %v1433_v59 }
 0x728   :  { %2943 = vmatprep.mubr.msk.bf16.mxu0 %vm3291_vm1, %v3290_v62 }
 0x796   :  { %v1058_v20 = vpop.f32.mrf.mxu0 }
 0x798   :  { %v2885_v42 = vpop.f32.mrf.mxu0 }
 0x79a   :  { %v1061_v43 = vpop.f32.mrf.mxu0 }
 0x79c   :  { %v2886_v44 = vpop.f32.mrf.mxu0 }
 0x7ab   :  { %v1010_v45 = vpop.f32.mrf.mxu1 }
 0x7ac   :  { %v1160_v46 = vpack.c.bf16 %v1058_v20, %v1010_v45 }
 0x7ad   :  { %v2879_v47 = vpop.f32.mrf.mxu1 }
 0x7ae   :  { %2901 = vmatprep.mubr.msk.bf16.mxu1 %vm276_vm2, %v1160_v46 }
 0x7af   :  { %v1013_v48 = vpop.f32.mrf.mxu1 }
 0x7b1   :  { %v2880_v49 = vpop.f32.mrf.mxu1 }
 0x7b3   :  { %v1106_v50 = vpop.f32.mrf.mxu1 }
 0x7b5   :  { %v2891_v51 = vpop.f32.mrf.mxu1 }
 0x7b7   :  { %v1109_v52 = vpop.f32.mrf.mxu1 }
 0x7b9   :  { %v2892_v53 = vpop.f32.mrf.mxu1 }
 0x7cf   :  { %v1154_v56 = vpop.f32.mrf.mxu0 }
 0x7d0   :  { %v1161_v57 = vpack.c.bf16 %v1154_v56, %v1106_v50 }
 0x7d1   :  { %v2897_v61 = vpop.f32.mrf.mxu0 }
 0x7d2   :  { %2902 = vmatmul.mubr.msk.bf16.vlgmr.msra.gmra.mxu1 %vm276_vm2, %v1161_v57 }
 0x7d3   :  { %2912 = vmatpush3.bf16.xpose.msra.mxu1 %v1290_v63  ;;  %v1157_v1 = vpop.f32.mrf.mxu0  ;;  %2913 = vmatprep.mubr.msk.bf16.mxu1 %vm3291_vm1, %v3290_v62 }
 0x7d4   :  { %2923 = vmatprep.subr.bf16.mxu1 %v3290_v62 }
 0x7d5   :  { %v2898_v2 = vpop.f32.mrf.mxu0 }
 0x7d7   :  { %v3631_v5 = vpop.f32.mrf.mxu0 }
 0x7d9   :  { %v3633_v6 = vpop.f32.mrf.mxu0 }
 0x7da   :  { %2914 = vmatmul.mubr.msk.bf16.vlgmr.msra.gmra.mxu1 %vm276_vm2, %v1283_v60 }
 0x7db   :  { %2924 = vmatpush3.bf16.xpose.msra.mxu1 %v1390_v7  ;;  %v3637_v10 = vpop.f32.mrf.mxu0  ;;  %2925 = vmatprep.mubr.msk.bf16.mxu1 %vm3291_vm1, %v3290_v62 }
 0x7dc   :  { %2935 = vmatprep.subr.bf16.mxu1 %v3290_v62 }
 0x7dd   :  { %v3642_v12 = vpop.f32.mrf.mxu0 }
 0x7df   :  { %v1376_v14 = vpop.f32.mrf.mxu0 }
 0x7e0   :  { %v1377_v15 = vadd.f32 %v2662_v13, %v1376_v14 }
 0x7e1   :  { %v2921_v18 = vpop.f32.mrf.mxu0 }
 0x7e2   :  { %2926 = vmatmul.mubr.msk.bf16.vlgmr.msra.gmra.mxu1 %vm276_vm2, %v1383_v17  ;;  %v1485_v21 = vsel %vm276_vm2, %v1377_v15, -inf }
 0x7e3   :  { %1486 = vmax.xlane.f32.xlu1 %v1485_v21  ;;  %v1379_v22 = vpop.f32.mrf.mxu0  ;;  %2937 = vmatprep.mubr.msk.bf16.mxu1 %vm3291_vm1, %v3290_v62 }
 0x7e5   :  { %v2922_v24 = vpop.f32.mrf.mxu0 }
 0x7e7   :  { %v1476_v25 = vpop.f32.mrf.mxu0 }
 0x7e8   :  { %v1477_v43 = vadd.f32 %v2662_v13, %v1476_v25 }
 0x7e9   :  { %v2933_v28 = vpop.f32.mrf.mxu0 }
 0x7ea   :  { %v1491_v47 = vsel %vm276_vm2, %v1477_v43, -inf }
 0x7eb   :  { %v1479_v29 = vpop.f32.mrf.mxu0 }
 0x7ed   :  { %v2934_v30 = vpop.f32.mrf.mxu0 }
 0x86c   :  { %v1487_v31 = vpop.xlane.xlu1 %1486 }
 0x86d   :  { %v1495_v32 = vsub.f32 %v1377_v15, %v1487_v31 }
 0x86f   :  { %v1500_v33 = vmul.f32 1.442695, %v1495_v32 }
 0x871   :  { %3124 = vpow2.f32 %v1500_v33 }
 0x87e   :  { %v3651_v34 = vpop.eup %3124 }
 0x87f   :  { %v1509_v35 = vsel %vm276_vm2, %v3651_v34, 0.0 }
 0x880   :  { %1510 = vadd.xlane.f32.xlu1 %v1509_v35 }
 0x892   :  { %v3655_v36 = vpop.f32.mrf.mxu1 }
 0x894   :  { %v3657_v37 = vpop.f32.mrf.mxu1 }
 0x896   :  { %v3659_v38 = vpop.f32.mrf.mxu1 }
 0x898   :  { %v3661_v39 = vpop.f32.mrf.mxu1 }
 0x89a   :  { %v1326_v40 = vpop.f32.mrf.mxu1 }
 0x89b   :  { %v1327_v41 = vadd.f32 %v2662_v13, %v1326_v40 }
 0x89c   :  { %v2915_v54 = vpop.f32.mrf.mxu1 }
 0x89d   :  { %v1482_v58 = vsel %vm276_vm2, %v1327_v41, -inf }
 0x89e   :  { %1483 = vmax.xlane.f32.xlu0 %v1482_v58  ;;  %v1329_v59 = vpop.f32.mrf.mxu1 }
 0x8a0   :  { %v2916_v0 = vpop.f32.mrf.mxu1 }
 0x8a2   :  { %v1426_v19 = vpop.f32.mrf.mxu1 }
 0x8a3   :  { %v1427_v20 = vadd.f32 %v2662_v13, %v1426_v19 }
 0x8a4   :  { %v2927_v42 = vpop.f32.mrf.mxu1 }
 0x8a5   :  { %v1488_v44 = vsel %vm276_vm2, %v1427_v20, -inf  ;;  %v1725_v42 = vld [vmem:[#allocation2 + $0x8] sm:$0xf] }
 0x8a6   :  { %1489 = vmax.xlane.f32.xlu0 %v1488_v44  ;;  %v1429_v45 = vpop.f32.mrf.mxu1 }
 0x8a8   :  { %v2928_v46 = vpop.f32.mrf.mxu1 }
 0x8aa   :  { %1492 = vmax.xlane.f32.xlu0 %v1491_v47 }
 0x909   :  { %v1511_v7 = vpop.xlane.xlu1 %1510 }
 0x927   :  { %v1484_v48 = vpop.xlane.xlu0 %1483 }
 0x928   :  { %v1494_v49 = vsub.f32 %v1327_v41, %v1484_v48 }
 0x92a   :  { %v1498_v50 = vmul.f32 1.442695, %v1494_v49 }
 0x92c   :  { %3126 = vpow2.f32 %v1498_v50 }
 0x92f   :  { %v1490_v51 = vpop.xlane.xlu0 %1489 }
 0x930   :  { %v1496_v52 = vsub.f32 %v1427_v20, %v1490_v51 }
 0x932   :  { %v1502_v53 = vmul.f32 1.442695, %v1496_v52 }
 0x933   :  { %v1493_v55 = vpop.xlane.xlu0 %1492 }
 0x934   :  { %3128 = vpow2.f32 %v1502_v53  ;;  %v1497_v56 = vsub.f32 %v1477_v43, %v1493_v55  ;;  %v1733_v43 = vsel %vm523_vm3, %v1725_v42, 0 }
 0x936   :  { %v1504_v57 = vmul.f32 1.442695, %v1497_v56 }
 0x938   :  { %3130 = vpow2.f32 %v1504_v57 }
 0x939   :  { %v3127_v60 = vpop.eup %3126  ;;  %3132 = vrcp.f32 %v1511_v7 }
 0x93a   :  { %v1506_v61 = vsel %vm276_vm2, %v3127_v60, 0.0 }
 0x93b   :  { %1507 = vadd.xlane.f32.xlu0 %v1506_v61 }
 0x941   :  { %v3129_v63 = vpop.eup %3128 }
 0x942   :  { %v1512_v1 = vsel %vm276_vm2, %v3129_v63, 0.0 }
 0x943   :  { %1513 = vadd.xlane.f32.xlu0 %v1512_v1 }
 0x945   :  { %v3131_v2 = vpop.eup %3130 }
 0x946   :  { %v1515_v3 = vsel %vm276_vm2, %v3131_v2, 0.0  ;;  %v3133_v15 = vpop.eup %3132 }
 0x947   :  { %1516 = vadd.xlane.f32.xlu1 %v1515_v3 }
 0x958   :  { %1578 = vrot.lane.b32.xlu1 %v3442_v8, %s3298_s11 }
 0x959   :  { %1530 = vrot.lane.b32.xlu0 %v3439_v4, %s3298_s11 }
 0x95c   :  { %1626 = vrot.lane.b32.xlu1 %v3445_v9, %s3298_s11 }
 0x95d   :  { %1792 = vrot.lane.b32.xlu0 %v3439_v4, %s3299_s25 }
 0x960   :  { %1674 = vrot.lane.b32.xlu1 %v3448_v11, %s3298_s11 }
 0x961   :  { %1790 = vrot.lane.b32.xlu0 %v3453_v16, %s3300_s26 }
 0x964   :  { %1842 = vrot.lane.b32.xlu1 %v3442_v8, %s3299_s25 }
 0x965   :  { %1892 = vrot.lane.b32.xlu0 %v3445_v9, %s3299_s25 }
 0x968   :  { %1840 = vrot.lane.b32.xlu1 %v3462_v23, %s3300_s26 }
 0x969   :  { %1890 = vrot.lane.b32.xlu0 %v3477_v27, %s3300_s26  ;;  %v1523_v27 = vmul.f32 %v3133_v15, %v3651_v34 }
 0x96b   :  { %v1527_v25 = vpack.c.bf16 %v1523_v27, %v1523_v27 }
 0x96c   :  { %1942 = vrot.lane.b32.xlu1 %v3448_v11, %s3299_s25 }
 0x970   :  { %1940 = vrot.lane.b32.xlu1 %v3470_v26, %s3300_s26 }
 0x9c4   :  { %v1508_v13 = vpop.xlane.xlu0 %1507 }
 0x9c5   :  { %3134 = vrcp.f32 %v1508_v13 }
 0x9cc   :  { %v1514_v14 = vpop.xlane.xlu0 %1513 }
 0x9cd   :  { %3136 = vrcp.f32 %v1514_v14  ;;  %v2673_v14 = vld [vmem:[%s3872_s7 + $0x18] sm:$0xff]  ;;  %s3301_s7 = smov 40  }
 0x9d0   :  { %v1517_v16 = vpop.xlane.xlu1 %1516  ;;  %v1531_v17 = vpop.permute.xlu0 %1530 }
 0x9d1   :  { %3138 = vrcp.f32 %v1517_v16  ;;  %v1536_v18 = vsel %vm523_vm3, %v1531_v17, 0 }
 0x9d2   :  { %v3135_v21 = vpop.eup %3134  ;;  %2936 = vmatpush3.bf16.msra.mxu1 %v1536_v18 }
 0x9d3   :  { %v1522_v23 = vmul.f32 %v3135_v21, %v3127_v60  ;;  %2947 = vmatprep.subr.bf16.mxu1 %v3290_v62 }
 0x9d4   :  { %v1579_v26 = vpop.permute.xlu1 %1578  ;;  %v1793_v32 = vpop.permute.xlu0 %1792 }
 0x9d5   :  { %v1584_v22 = vsel %vm523_vm3, %v1579_v26, 0  ;;  %v1526_v24 = vpack.c.bf16 %v1522_v23, %v1522_v23  ;;  %v1798_v59 = vsel %vm276_vm2, %v1793_v32, 0 }
 0x9d6   :  { %2942 = vmatpush3.bf16.msra.mxu0 %v1584_v22 }
 0x9d7   :  { %2938 = vmatmul.mubr.msk.bf16.vlgmr.msra.gmra.mxu1 %vm276_vm2, %v1526_v24  ;;  %2953 = vmatprep.subr.bf16.mxu0 %v3290_v62 }
 0x9d8   :  { %v1627_v28 = vpop.permute.xlu1 %1626  ;;  %2949 = vmatprep.mubr.msk.bf16.mxu1 %vm3291_vm1, %v3290_v62  ;;  %v1791_v58 = vpop.permute.xlu0 %1790 }
 0x9d9   :  { %v1632_v29 = vsel %vm523_vm3, %v1627_v28, 0  ;;  %2944 = vmatmul.mubr.msk.bf16.vlgmr.msra.gmra.mxu0 %vm276_vm2, %v1527_v25 }
 0x9da   :  { %v3137_v30 = vpop.eup %3136  ;;  %2948 = vmatpush3.bf16.msra.mxu1 %v1632_v29  ;;  %2955 = vmatprep.mubr.msk.bf16.mxu0 %vm3291_vm1, %v3290_v62 }
 0x9db   :  { %v1524_v31 = vmul.f32 %v3137_v30, %v3129_v63  ;;  %3049 = vmatprep.subr.msk.bf16.mxu1 %vm523_vm3, %v1725_v42 }
 0x9dc   :  { %v1675_v33 = vpop.permute.xlu1 %1674  ;;  %v1893_v0 = vpop.permute.xlu0 %1892 }
 0x9dd   :  { %v1680_v34 = vsel %vm523_vm3, %v1675_v33, 0  ;;  %v1528_v35 = vpack.c.bf16 %v1524_v31, %v1524_v31  ;;  %v1898_v19 = vsel %vm276_vm2, %v1893_v0, 0  ;;  %v1274_v33 = vadd.f32 %v3631_v5, %v3655_v36 }
 0x9de   :  { %v3139_v40 = vpop.eup %3138  ;;  %2954 = vmatpush3.bf16.msra.mxu0 %v1680_v34  ;;  %v1269_v5 = vadd.f32 %v3642_v12, %v3661_v39 }
 0x9df   :  { %2950 = vmatmul.mubr.msk.bf16.vlgmr.msra.gmra.mxu1 %vm276_vm2, %v1528_v35  ;;  %2965 = vmatprep.subr.bf16.mxu0 %v3290_v62  ;;  %v1525_v41 = vmul.f32 %v3139_v40, %v3131_v2 }
 0x9e0   :  { %v1891_v20 = vpop.permute.xlu0 %1890  ;;  %2960 = vmatpush3.bf16.msra.mxu1 %v1733_v43  ;;  %v1843_v52 = vpop.permute.xlu1 %1842 }
 0x9e1   :  { %v1529_v54 = vpack.c.bf16 %v1525_v41, %v1525_v41  ;;  %2971 = vmatprep.subr.bf16.mxu1 %v3290_v62  ;;  %v1848_v3 = vsel %vm276_vm2, %v1843_v52, 0  ;;  %v1266_v41 = vadd.f32 %v3633_v6, %v3657_v37 }
 0x9e3   :  { %2956 = vmatmul.mubr.msk.bf16.vlgmr.msra.gmra.mxu0 %vm276_vm2, %v1529_v54 }
 0x9e4   :  { %2966 = vmatpush3.bf16.xpose.msra.mxu0 %v1798_v59  ;;  %2967 = vmatprep.mubr.msk.bf16.mxu0 %vm3291_vm1, %v3290_v62  ;;  %v1841_v61 = vpop.permute.xlu1 %1840  ;;  %v1277_v59 = vadd.f32 %v3637_v10, %v3659_v38 }
 0x9e5   :  { %2977 = vmatprep.subr.bf16.mxu0 %v3290_v62 }
 0x9e8   :  { %v1943_v15 = vpop.permute.xlu1 %1942 }
 0x9e9   :  { %v1948_v21 = vsel %vm276_vm2, %v1943_v15, 0 }
 0x9eb   :  { %2968 = vmatmul.mubr.msk.bf16.vlgmr.msra.gmra.mxu0 %vm276_vm2, %v1791_v58 }
 0x9ec   :  { %2978 = vmatpush3.bf16.xpose.msra.mxu0 %v1898_v19  ;;  %2979 = vmatprep.mubr.msk.bf16.mxu0 %vm3291_vm1, %v3290_v62  ;;  %v1941_v25 = vpop.permute.xlu1 %1940 }
 0x9ed   :  { %2989 = vmatprep.subr.bf16.mxu0 %v3290_v62 }
 0x9f3   :  { %2980 = vmatmul.mubr.msk.bf16.vlgmr.msra.gmra.mxu0 %vm276_vm2, %v1891_v20 }
 0x9f4   :  { %2991 = vmatprep.mubr.msk.bf16.mxu0 %vm3291_vm1, %v3290_v62 }
 0xa97   :  { %v1572_v44 = vpop.f32.mrf.mxu1 }
 0xa99   :  { %v2939_v45 = vpop.f32.mrf.mxu1  ;;  %v1620_v46 = vpop.f32.mrf.mxu0 }
 0xa9a   :  { %v1722_v47 = vpack.c.bf16 %v1620_v46, %v1572_v44 }
 0xa9b   :  { %v1575_v48 = vpop.f32.mrf.mxu1  ;;  %v2945_v49 = vpop.f32.mrf.mxu0 }
 0xa9c   :  { %2961 = vmatprep.mubr.msk.bf16.mxu1 %vm276_vm2, %v1722_v47 }
 0xa9d   :  { %v2940_v50 = vpop.f32.mrf.mxu1  ;;  %v1623_v51 = vpop.f32.mrf.mxu0 }
 0xa9f   :  { %v2946_v53 = vpop.f32.mrf.mxu0  ;;  %v1668_v55 = vpop.f32.mrf.mxu1 }
 0xaa1   :  { %v2951_v56 = vpop.f32.mrf.mxu1 }
 0xaa3   :  { %v1671_v57 = vpop.f32.mrf.mxu1  ;;  %v1716_v60 = vpop.f32.mrf.mxu0 }
 0xaa4   :  { %v1723_v63 = vpack.c.bf16 %v1716_v60, %v1668_v55 }
 0xaa5   :  { %v2952_v1 = vpop.f32.mrf.mxu1  ;;  %v2957_v2 = vpop.f32.mrf.mxu0 }
 0xaa6   :  { %2962 = vmatmul.mubr.msk.bf16.vlgmr.msra.gmra.mxu1 %vm276_vm2, %v1723_v63 }
 0xaa7   :  { %2972 = vmatpush3.bf16.xpose.msra.mxu1 %v1848_v3  ;;  %v1719_v7 = vpop.f32.mrf.mxu0  ;;  %2973 = vmatprep.mubr.msk.bf16.mxu1 %vm3291_vm1, %v3290_v62 }
 0xaa8   :  { %2983 = vmatprep.subr.bf16.mxu1 %v3290_v62 }
 0xaa9   :  { %v2958_v13 = vpop.f32.mrf.mxu0 }
 0xaab   :  { %v1834_v16 = vpop.f32.mrf.mxu0 }
 0xaac   :  { %v1835_v17 = vadd.f32 %v2673_v14, %v1834_v16 }
 0xaad   :  { %v2969_v18 = vpop.f32.mrf.mxu0 }
 0xaae   :  { %2974 = vmatmul.mubr.msk.bf16.vlgmr.msra.gmra.mxu1 %vm276_vm2, %v1841_v61  ;;  %v1990_v23 = vsel %vm276_vm2, %v1835_v17, -inf }
 0xaaf   :  { %2984 = vmatpush3.bf16.xpose.msra.mxu1 %v1948_v21  ;;  %1991 = vmax.xlane.f32.xlu0 %v1990_v23  ;;  %v1837_v27 = vpop.f32.mrf.mxu0 }
 0xab0   :  { %2985 = vmatprep.mubr.msk.bf16.mxu1 %vm3291_vm1, %v3290_v62  ;;  %2995 = vmatprep.subr.bf16.mxu1 %v3290_v62 }
 0xab1   :  { %v2970_v26 = vpop.f32.mrf.mxu0 }
 0xab3   :  { %v1934_v22 = vpop.f32.mrf.mxu0 }
 0xab4   :  { %v1935_v24 = vadd.f32 %v2673_v14, %v1934_v22 }
 0xab5   :  { %v2981_v28 = vpop.f32.mrf.mxu0 }
 0xab6   :  { %2986 = vmatmul.mubr.msk.bf16.vlgmr.msra.gmra.mxu1 %vm276_vm2, %v1941_v25  ;;  %v1996_v29 = vsel %vm276_vm2, %v1935_v24, -inf }
 0xab7   :  { %1997 = vmax.xlane.f32.xlu0 %v1996_v29  ;;  %v1937_v30 = vpop.f32.mrf.mxu0  ;;  %2997 = vmatprep.mubr.msk.bf16.mxu1 %vm3291_vm1, %v3290_v62 }
 0xab9   :  { %v2982_v31 = vpop.f32.mrf.mxu0 }
 0xb38   :  { %v1992_v32 = vpop.xlane.xlu0 %1991 }
 0xb39   :  { %v2002_v34 = vsub.f32 %v1835_v17, %v1992_v32 }
 0xb3b   :  { %v2006_v0 = vmul.f32 1.442695, %v2002_v34 }
 0xb3d   :  { %3140 = vpow2.f32 %v2006_v0 }
 0xb40   :  { %v1998_v35 = vpop.xlane.xlu0 %1997 }
 0xb41   :  { %v2004_v19 = vsub.f32 %v1935_v24, %v1998_v35 }
 0xb43   :  { %v2010_v44 = vmul.f32 1.442695, %v2004_v19 }
 0xb45   :  { %3142 = vpow2.f32 %v2010_v44  ;;  %v2233_v44 = vld [vmem:[#allocation2 + $0xc] sm:$0xf] }
 0xb4a   :  { %v3141_v39 = vpop.eup %3140 }
 0xb4b   :  { %v2014_v53 = vsel %vm276_vm2, %v3141_v39, 0.0 }
 0xb52   :  { %v3143_v55 = vpop.eup %3142 }
 0xb53   :  { %v2020_v56 = vsel %vm276_vm2, %v3143_v55, 0.0 }
 0xb66   :  { %v2963_v40 = vpop.f32.mrf.mxu1 }
 0xb67   :  { %v3735_v54 = vadd.f32 %v2963_v40, %v1274_v33 }
 0xb68   :  { %v1769_v58 = vpop.f32.mrf.mxu1 }
 0xb69   :  { %v3739_v20 = vadd.f32 %v1769_v58, %v1266_v41 }
 0xb6a   :  { %v2964_v42 = vpop.f32.mrf.mxu1 }
 0xb6b   :  { %v3743_v36 = vadd.f32 %v2964_v42, %v1277_v59 }
 0xb6c   :  { %v1772_v43 = vpop.f32.mrf.mxu1 }
 0xb6d   :  { %v3745_v6 = vadd.f32 %v1772_v43, %v1269_v5 }
 0xb6e   :  { %v1884_v37 = vpop.f32.mrf.mxu1 }
 0xb6f   :  { %v1885_v45 = vadd.f32 %v2673_v14, %v1884_v37  ;;  %v2241_v37 = vsel %vm523_vm3, %v2233_v44, 0 }
 0xb70   :  { %v2975_v46 = vpop.f32.mrf.mxu1 }
 0xb71   :  { %v1993_v10 = vsel %vm276_vm2, %v1885_v45, -inf }
 0xb72   :  { %1994 = vmax.xlane.f32.xlu1 %v1993_v10  ;;  %v1887_v38 = vpop.f32.mrf.mxu1 }
 0xb74   :  { %v2976_v47 = vpop.f32.mrf.mxu1 }
 0xb76   :  { %v1984_v48 = vpop.f32.mrf.mxu1 }
 0xb77   :  { %v1985_v49 = vadd.f32 %v2673_v14, %v1984_v48 }
 0xb78   :  { %v2987_v50 = vpop.f32.mrf.mxu1 }
 0xb79   :  { %v1999_v12 = vsel %vm276_vm2, %v1985_v49, -inf }
 0xb7a   :  { %2000 = vmax.xlane.f32.xlu0 %v1999_v12  ;;  %v1987_v51 = vpop.f32.mrf.mxu1 }
 0xb7c   :  { %v2988_v52 = vpop.f32.mrf.mxu1 }
 0xb7e   :  { %2015 = vadd.xlane.f32.xlu0 %v2014_v53 }
 0xb82   :  { %2021 = vadd.xlane.f32.xlu0 %v2020_v56  ;;  %v3172_v56 = vld [vmem:[%s3865_s0 + $0x10] sm:$0xff] }
 0xb83   :  { %2086 = vrot.lane.b32.xlu1 %v3442_v8, %s3301_s7 }
 0xb87   :  { %2134 = vrot.lane.b32.xlu1 %v3445_v9, %s3301_s7 }
 0xb98   :  { %2038 = vrot.lane.b32.xlu0 %v3439_v4, %s3301_s7 }
 0xbfb   :  { %v1995_v57 = vpop.xlane.xlu1 %1994 }
 0xbfc   :  { %v2003_v60 = vsub.f32 %v1885_v45, %v1995_v57 }
 0xbfe   :  { %v2008_v61 = vmul.f32 1.442695, %v2003_v60  ;;  %v3173_v60 = vld [vmem:[%s3865_s0] sm:$0xff] }
 0xbff   :  { %v2087_v63 = vpop.permute.xlu1 %2086 }
 0xc00   :  { %3144 = vpow2.f32 %v2008_v61  ;;  %v2092_v1 = vsel %vm523_vm3, %v2087_v63, 0 }
 0xc01   :  { %2996 = vmatpush3.bf16.msra.mxu1 %v2092_v1 }
 0xc02   :  { %3007 = vmatprep.subr.bf16.mxu1 %v3290_v62 }
 0xc03   :  { %v2001_v2 = vpop.xlane.xlu0 %2000  ;;  %v2135_v23 = vpop.permute.xlu1 %2134 }
 0xc04   :  { %v2005_v3 = vsub.f32 %v1985_v49, %v2001_v2  ;;  %v2140_v22 = vsel %vm523_vm3, %v2135_v23, 0 }
 0xc06   :  { %v2012_v7 = vmul.f32 1.442695, %v2005_v3 }
 0xc07   :  { %v2016_v8 = vpop.xlane.xlu0 %2015 }
 0xc08   :  { %3146 = vpow2.f32 %v2012_v7  ;;  %v3174_v7 = vld [vmem:[%s3865_s0 + $0x18] sm:$0xff] }
 0xc09   :  { %3148 = vrcp.f32 %v2016_v8 }
 0xc0b   :  { %v2022_v9 = vpop.xlane.xlu0 %2021 }
 0xc0c   :  { %3150 = vrcp.f32 %v2022_v9 }
 0xc0d   :  { %v3145_v13 = vpop.eup %3144 }
 0xc0e   :  { %v2017_v4 = vsel %vm276_vm2, %v3145_v13, 0.0 }
 0xc0f   :  { %2018 = vadd.xlane.f32.xlu1 %v2017_v4  ;;  %v2039_v14 = vpop.permute.xlu0 %2038 }
 0xc10   :  { %v2044_v15 = vsel %vm523_vm3, %v2039_v14, 0 }
 0xc11   :  { %2990 = vmatpush3.bf16.msra.mxu0 %v2044_v15 }
 0xc12   :  { %3001 = vmatprep.subr.bf16.mxu0 %v3290_v62 }
 0xc15   :  { %v3147_v16 = vpop.eup %3146 }
 0xc16   :  { %v3149_v17 = vpop.eup %3148  ;;  %v2023_v18 = vsel %vm276_vm2, %v3147_v16, 0.0 }
 0xc17   :  { %2024 = vadd.xlane.f32.xlu1 %v2023_v18  ;;  %v2030_v21 = vmul.f32 %v3149_v17, %v3141_v39 }
 0xc19   :  { %v2034_v27 = vpack.c.bf16 %v2030_v21, %v2030_v21  ;;  %v3151_v26 = vpop.eup %3150 }
 0xc1a   :  { %v2032_v24 = vmul.f32 %v3151_v26, %v3143_v55 }
 0xc1b   :  { %2992 = vmatmul.mubr.msk.bf16.vlgmr.msra.gmra.mxu0 %vm276_vm2, %v2034_v27 }
 0xc1c   :  { %3002 = vmatpush3.bf16.msra.mxu0 %v2140_v22  ;;  %3003 = vmatprep.mubr.msk.bf16.mxu0 %vm3291_vm1, %v3290_v62  ;;  %v2036_v25 = vpack.c.bf16 %v2032_v24, %v2032_v24 }
 0xc1d   :  { %3050 = vmatprep.subr.msk.bf16.mxu0 %vm523_vm3, %v2233_v44 }
 0xc23   :  { %3004 = vmatmul.mubr.msk.bf16.vlgmr.msra.gmra.mxu0 %vm276_vm2, %v2036_v25 }
 0xc24   :  { %3014 = vmatpush3.bf16.msra.mxu0 %v2241_v37 }
 0xc28   :  { %2182 = vrot.lane.b32.xlu1 %v3448_v11, %s3301_s7 }
 0xc98   :  { %v2019_v28 = vpop.xlane.xlu1 %2018 }
 0xc99   :  { %3152 = vrcp.f32 %v2019_v28 }
 0xca0   :  { %v2025_v29 = vpop.xlane.xlu1 %2024 }
 0xca1   :  { %3154 = vrcp.f32 %v2025_v29 }
 0xca4   :  { %v2183_v32 = vpop.permute.xlu1 %2182 }
 0xca5   :  { %v2188_v34 = vsel %vm523_vm3, %v2183_v32, 0 }
 0xca6   :  { %v3153_v30 = vpop.eup %3152 }
 0xca7   :  { %v2031_v31 = vmul.f32 %v3153_v30, %v3145_v13 }
 0xca9   :  { %v2035_v33 = vpack.c.bf16 %v2031_v31, %v2031_v31 }
 0xcab   :  { %2998 = vmatmul.mubr.msk.bf16.vlgmr.msra.gmra.mxu1 %vm276_vm2, %v2035_v33 }
 0xcac   :  { %3008 = vmatpush3.bf16.msra.mxu1 %v2188_v34  ;;  %3009 = vmatprep.mubr.msk.bf16.mxu1 %vm3291_vm1, %v3290_v62 }
 0xcae   :  { %v3155_v35 = vpop.eup %3154 }
 0xcaf   :  { %v2033_v40 = vmul.f32 %v3155_v35, %v3147_v16 }
 0xcb1   :  { %v2037_v41 = vpack.c.bf16 %v2033_v40, %v2033_v40 }
 0xcb3   :  { %3010 = vmatmul.mubr.msk.bf16.vlgmr.msra.gmra.mxu1 %vm276_vm2, %v2037_v41 }
 0xcdb   :  { %v2080_v11 = vpop.f32.mrf.mxu0 }
 0xcdd   :  { %v2993_v58 = vpop.f32.mrf.mxu0 }
 0xcde   :  { %v3074_v58 = vld [vmem:[#allocation7 + $0x8] sm:$0xff]  }
 0xcdf   :  { %v2083_v59 = vpop.f32.mrf.mxu0  ;;  %3019 = vmatprep.subr.bf16.mxu1 %v3074_v58 }
 0xce0   :  { %v3075_v59 = vld [vmem:[#allocation7] sm:$0xff]   ;;  %3020 = vmatpush3.bf16.msra.mxu1 %v3074_v58 }
 0xce1   :  { %v2994_v0 = vpop.f32.mrf.mxu0  ;;  %3021 = vmatprep.subr.bf16.mxu1 %v3075_v59 }
 0xce3   :  { %v2176_v19 = vpop.f32.mrf.mxu0 }
 0xce4   :  { %3022 = vmatpush3.bf16.msra.mxu1 %v3075_v59 }
 0xce5   :  { %v3005_v42 = vpop.f32.mrf.mxu0 }
 0xce7   :  { %v2179_v5 = vpop.f32.mrf.mxu0 }
 0xce9   :  { %v3006_v43 = vpop.f32.mrf.mxu0 }
 0xd6b   :  { %v2128_v62 = vpop.f32.mrf.mxu1 }
 0xd6c   :  { %v2230_v45 = vpack.c.bf16 %v2128_v62, %v2080_v11 }
 0xd6d   :  { %v2999_v46 = vpop.f32.mrf.mxu1 }
 0xd6e   :  { %3015 = vmatprep.mubr.msk.bf16.mxu0 %vm276_vm2, %v2230_v45 }
 0xd6f   :  { %v2131_v10 = vpop.f32.mrf.mxu1 }
 0xd71   :  { %v3000_v38 = vpop.f32.mrf.mxu1 }
 0xd73   :  { %v2224_v47 = vpop.f32.mrf.mxu1 }
 0xd74   :  { %v2231_v48 = vpack.c.bf16 %v2224_v47, %v2176_v19 }
 0xd75   :  { %v3011_v49 = vpop.f32.mrf.mxu1 }
 0xd76   :  { %3016 = vmatmul.mubr.msk.bf16.vlgmr.msra.gmra.mxu0 %vm276_vm2, %v2231_v48  ;;  %v2685_v49 = vld [vmem:[%s3873_s8] ss:$0 sm:$0xff] }
 0xd77   :  { %v2227_v50 = vpop.f32.mrf.mxu1 }
 0xd79   :  { %v3012_v12 = vpop.f32.mrf.mxu1 }
 0xe36   :  { %v3017_v39 = vpop.f32.mrf.mxu0 }
 0xe37   :  { %v2294_v51 = vadd.f32 %v3017_v39, %v3735_v54  ;;  %v2684_v54 = vld [vmem:[%s3871_s6] ss:$0 sm:$0xff] }
 0xe38   :  { %v2277_v52 = vpop.f32.mrf.mxu0 }
 0xe39   :  { %v2292_v53 = vadd.f32 %v2277_v52, %v3739_v20  ;;  %v2298_v57 = vadd.f32 %v3172_v56, %v2294_v51 }
 0xe3a   :  { %v3018_v55 = vpop.f32.mrf.mxu0 }
 0xe3b   :  { %v2296_v61 = vadd.f32 %v3173_v60, %v2292_v53  ;;  %v2295_v63 = vadd.f32 %v3018_v55, %v3743_v36  ;;  %v3794_v3 = vadd.f32 %v2684_v54, %v2298_v57  ;;  %v3175_v36 = vld [vmem:[%s3865_s0 + $0x8] sm:$0xff]  ;;  %v2686_v53 = vld [vmem:[#allocation5] ss:$0 sm:$0xff] }
 0xe3c   :  { %v2280_v1 = vpop.f32.mrf.mxu0 }
 0xe3d   :  { %v3791_v2 = vadd.f32 %v2684_v54, %v2296_v61  ;;  %v2293_v20 = vadd.f32 %v2280_v1, %v3745_v6  ;;  %v2299_v8 = vadd.f32 %v3174_v7, %v2295_v63  ;;  %v2317_v6 = vsel %vm104_vm0, %v3794_v3, 0.0 }
 0xe3f   :  { %v2297_v9 = vadd.f32 %v3175_v36, %v2293_v20  ;;  %v2311_v13 = vsel %vm104_vm0, %v3791_v2, 0.0  ;;  %v3806_v14 = vadd.f32 %v2684_v54, %v2299_v8  ;;  %v3076_v36 = vld [vmem:[%s3877_s12 + $0x38] sm:$0xff]  }
 0xe40   :  { %2312 = vadd.xlane.f32.xlu0 %v2311_v13  ;;  %3027 = vmatprep.subr.bf16.mxu0 %v3076_v36  ;;  %v3078_v13 = vld [vmem:[%s3877_s12 + $0x28] sm:$0xff]  }
 0xe41   :  { %v3804_v4 = vadd.f32 %v2684_v54, %v2297_v9  ;;  %v2320_v16 = vsel %vm104_vm0, %v3806_v14, 0.0  ;;  %3028 = vmatpush3.bf16.msra.mxu0 %v3076_v36  ;;  %v3077_v9 = vld [vmem:[%s3877_s12 + $0x30] sm:$0xff]  }
 0xe42   :  { %3029 = vmatprep.subr.bf16.mxu0 %v3077_v9 }
 0xe43   :  { %v2314_v15 = vsel %vm104_vm0, %v3804_v4, 0.0 }
 0xe44   :  { %2318 = vadd.xlane.f32.xlu0 %v2317_v6  ;;  %2315 = vadd.xlane.f32.xlu1 %v2314_v15  ;;  %v3079_v6 = vld [vmem:[%s3877_s12 + $0x20] sm:$0xff]   ;;  %v3080_v15 = vld [vmem:[%s3877_s12 + $0x18] sm:$0xff]  }
 0xe45   :  { %3030 = vmatpush3.bf16.msra.mxu0 %v3077_v9 }
 0xe46   :  { %3031 = vmatprep.subr.bf16.mxu0 %v3078_v13 }
 0xe48   :  { %2321 = vadd.xlane.f32.xlu0 %v2320_v16  ;;  %v3081_v16 = vld [vmem:[%s3877_s12 + $0x10] sm:$0xff]  }
 0xe49   :  { %3032 = vmatpush3.bf16.msra.mxu0 %v3078_v13 }
 0xe4a   :  { %3033 = vmatprep.subr.bf16.mxu0 %v3079_v6 }
 0xe4d   :  { %3034 = vmatpush3.bf16.msra.mxu0 %v3079_v6 }
 0xe4e   :  { %3035 = vmatprep.subr.bf16.mxu0 %v3080_v15 }
 0xe51   :  { %3036 = vmatpush3.bf16.msra.mxu0 %v3080_v15 }
 0xe52   :  { %3037 = vmatprep.subr.bf16.mxu0 %v3081_v16 }
 0xe55   :  { %3038 = vmatpush3.bf16.msra.mxu0 %v3081_v16 }
 0xec9   :  { %v2313_v17 = vpop.xlane.xlu0 %2312 }
 0xeca   :  { %v2323_v18 = vmul.f32 0.03125, %v2313_v17  ;;  %v3082_v17 = vld [vmem:[%s3877_s12 + $0x8] sm:$0xff]  }
 0xecb   :  { %3039 = vmatprep.subr.bf16.mxu0 %v3082_v17 }
 0xecc   :  { %v2327_v21 = vsub.f32 %v3791_v2, %v2323_v18  ;;  %3040 = vmatpush3.bf16.msra.mxu0 %v3082_v17  ;;  %v3083_v18 = vld [vmem:[%s3877_s12] sm:$0xff]  }
 0xecd   :  { %v2319_v23 = vpop.xlane.xlu0 %2318  ;;  %v2316_v27 = vpop.xlane.xlu1 %2315  ;;  %3041 = vmatprep.subr.bf16.mxu0 %v3083_v18 }
 0xece   :  { %v2325_v26 = vmul.f32 0.03125, %v2319_v23  ;;  %v2324_v22 = vmul.f32 0.03125, %v2316_v27  ;;  %v2331_v24 = vmul.f32 %v2327_v21, %v2327_v21 }
 0xed0   :  { %v2329_v25 = vsub.f32 %v3794_v3, %v2325_v26  ;;  %v2328_v28 = vsub.f32 %v3804_v4, %v2324_v22  ;;  %v2335_v29 = vsel %vm104_vm0, %v2331_v24, 0.0  ;;  %3042 = vmatpush3.bf16.msra.mxu0 %v3083_v18 }
 0xed1   :  { %2336 = vadd.xlane.f32.xlu0 %v2335_v29  ;;  %v2322_v30 = vpop.xlane.xlu0 %2321 }
 0xed2   :  { %v2326_v31 = vmul.f32 0.03125, %v2322_v30  ;;  %v2333_v32 = vmul.f32 %v2329_v25, %v2329_v25  ;;  %v2332_v33 = vmul.f32 %v2328_v28, %v2328_v28 }
 0xed4   :  { %v2330_v34 = vsub.f32 %v3806_v14, %v2326_v31  ;;  %v2341_v35 = vsel %vm104_vm0, %v2333_v32, 0.0  ;;  %v2338_v40 = vsel %vm104_vm0, %v2332_v33, 0.0 }
 0xed5   :  { %2342 = vadd.xlane.f32.xlu0 %v2341_v35  ;;  %2339 = vadd.xlane.f32.xlu1 %v2338_v40 }
 0xed6   :  { %v2334_v41 = vmul.f32 %v2330_v34, %v2330_v34 }
 0xed8   :  { %v2344_v11 = vsel %vm104_vm0, %v2334_v41, 0.0 }
 0xed9   :  { %2345 = vadd.xlane.f32.xlu1 %v2344_v11 }
 0xf5a   :  { %v2337_v0 = vpop.xlane.xlu0 %2336 }
 0xf5b   :  { %v2347_v19 = vmul.f32 0.03125, %v2337_v0 }
 0xf5d   :  { %v2351_v42 = vadd.f32 1e-05, %v2347_v19 }
 0xf5e   :  { %v2343_v5 = vpop.xlane.xlu0 %2342  ;;  %v2340_v43 = vpop.xlane.xlu1 %2339 }
 0xf5f   :  { %3156 = vrsqrt.f32 %v2351_v42  ;;  %v2349_v44 = vmul.f32 0.03125, %v2343_v5  ;;  %v2348_v37 = vmul.f32 0.03125, %v2340_v43 }
 0xf61   :  { %v2353_v62 = vadd.f32 1e-05, %v2349_v44  ;;  %v2352_v45 = vadd.f32 1e-05, %v2348_v37 }
 0xf62   :  { %v2346_v46 = vpop.xlane.xlu1 %2345 }
 0xf63   :  { %3158 = vrsqrt.f32 %v2353_v62  ;;  %v2350_v10 = vmul.f32 0.03125, %v2346_v46 }
 0xf64   :  { %3160 = vrsqrt.f32 %v2352_v45 }
 0xf65   :  { %v2354_v38 = vadd.f32 1e-05, %v2350_v10 }
 0xf67   :  { %3162 = vrsqrt.f32 %v2354_v38  ;;  %v2692_v38 = vld [vmem:[%s3878_s13] ss:$0 sm:$0xff]  ;;  %s3256_s13 = scalar_lea.vmem %s2621_s9, 512 }
 0xf68   :  { %p3257_p6 = scmp.ne.s32.totalorder %s2621_s9, %s3256_s13  ;;  %p3262_p8 = scmp.lt.s32.totalorder %s3256_s13, %s3256_s13 }
 0xf6a   :  { %p3263_p9 = por %p3262_p8, %p3261_p7 }
 0xf6c   :  { %v3157_v47 = vpop.eup %3156  ;;  %p3264_p10 = pnand %p3263_p9, %p3257_p6 }
 0xf6d   :  { %v2359_v48 = vmul.f32 %v3157_v47, %v2327_v21  ;;  %v2687_v21 = vld [vmem:[#allocation8] ss:$0 sm:$0xff] }
 0xf6f   :  { %v2370_v52 = vmul.f32 %v2685_v49, %v2359_v48 }
 0xf70   :  { %v3159_v50 = vpop.eup %3158 }
 0xf71   :  { %v3161_v12 = vpop.eup %3160  ;;  %v2361_v39 = vmul.f32 %v3159_v50, %v2329_v25  ;;  %v2381_v61 = vadd.f32 %v2686_v53, %v2370_v52 }
 0xf72   :  { %v2360_v51 = vmul.f32 %v3161_v12, %v2328_v28 }
 0xf73   :  { %v2372_v60 = vmul.f32 %v2685_v49, %v2361_v39 }
 0xf74   :  { %v3163_v55 = vpop.eup %3162  ;;  %v2371_v56 = vmul.f32 %v2685_v49, %v2360_v51 }
 0xf75   :  { %v2362_v57 = vmul.f32 %v3163_v55, %v2330_v34  ;;  %v2383_v20 = vadd.f32 %v2686_v53, %v2372_v60 }
 0xf76   :  { %v2382_v63 = vadd.f32 %v2686_v53, %v2371_v56 }
 0xf77   :  { %v2373_v54 = vmul.f32 %v2685_v49, %v2362_v57 }
 0xf78   :  { %v2385_v1 = vpack.c.bf16 %v2382_v63, %v2381_v61 }
 0xf79   :  { %v2384_v7 = vadd.f32 %v2686_v53, %v2373_v54 }
 0xf7a   :  { %3023 = vmatprep.mubr.msk.bf16.mxu1 %vm104_vm0, %v2385_v1 }
 0xf7b   :  { %v2386_v8 = vpack.c.bf16 %v2384_v7, %v2383_v20 }
 0xf7d   :  { %3024 = vmatmul.mubr.msk.bf16.vlgmr.msra.gmra.mxu1 %vm104_vm0, %v2386_v8 }
0x103d   :  { %v3025_v23 = vpop.f32.mrf.mxu1 }
0x103e   :  { %v2459_v27 = vadd.f32 %v3025_v23, %v2687_v21 }
0x103f   :  { %v2450_v26 = vpop.f32.mrf.mxu1 }
0x1040   :  { %v2451_v22 = vadd.f32 %v2687_v21, %v2450_v26  ;;  %v2471_v24 = vmul.f32 0.70710677, %v2459_v27  ;;  %v2467_v43 = vmul.f32 0.5, %v2459_v27 }
0x1041   :  { %v3026_v25 = vpop.f32.mrf.mxu1 }
0x1042   :  { %v2469_v28 = vmul.f32 0.70710677, %v2451_v22  ;;  %v2462_v29 = vadd.f32 %v3026_v25, %v2687_v21  ;;  %v2465_v19 = vmul.f32 0.5, %v2451_v22 }
0x1043   :  { %v2453_v30 = vpop.f32.mrf.mxu1 }
0x1044   :  { %3164 = verf.f32 %v2469_v28  ;;  %v2472_v31 = vmul.f32 0.70710677, %v2462_v29  ;;  %v2454_v32 = vadd.f32 %v2687_v21, %v2453_v30  ;;  %v2468_v0 = vmul.f32 0.5, %v2462_v29 }
0x1045   :  { %3166 = verf.f32 %v2471_v24 }
0x1046   :  { %3168 = verf.f32 %v2472_v31  ;;  %v2470_v33 = vmul.f32 0.70710677, %v2454_v32  ;;  %v2466_v42 = vmul.f32 0.5, %v2454_v32 }
0x1048   :  { %3170 = verf.f32 %v2470_v33 }
0x1051   :  { %v3165_v34 = vpop.eup %3164 }
0x1052   :  { %v3167_v35 = vpop.eup %3166  ;;  %v2477_v41 = vadd.f32 1.0, %v3165_v34 }
0x1053   :  { %v3169_v40 = vpop.eup %3168  ;;  %v2479_v59 = vadd.f32 1.0, %v3167_v35 }
0x1054   :  { %v2480_v11 = vadd.f32 1.0, %v3169_v40  ;;  %v2481_v37 = vmul.f32 %v2477_v41, %v2465_v19 }
0x1055   :  { %v3171_v58 = vpop.eup %3170  ;;  %v2483_v45 = vmul.f32 %v2479_v59, %v2467_v43 }
0x1056   :  { %v2478_v5 = vadd.f32 1.0, %v3171_v58  ;;  %v2484_v44 = vmul.f32 %v2480_v11, %v2468_v0 }
0x1058   :  { %v2482_v62 = vmul.f32 %v2478_v5, %v2466_v42  ;;  %v2486_v10 = vpack.c.bf16 %v2484_v44, %v2483_v45 }
0x105a   :  { %v2485_v46 = vpack.c.bf16 %v2482_v62, %v2481_v37 }
0x105c   :  { %3043 = vmatprep.mubr.bf16.mxu0 %v2485_v46 }
0x105d   :  { %3044 = vmatmul.mubr.bf16.vlgmr.msra.gmra.mxu0 %v2486_v10 }
0x111d   :  { %v3045_v47 = vpop.f32.mrf.mxu0 }
0x111e   :  { %v2601_v48 = vadd.f32 %v3045_v47, %v2692_v38 }
0x111f   :  { %v2592_v49 = vpop.f32.mrf.mxu0 }
0x1120   :  { %v2609_v50 = vadd.f32 %v2601_v48, %v3794_v3  ;;  %v2593_v12 = vadd.f32 %v2692_v38, %v2592_v49 }
0x1121   :  { %v3046_v39 = vpop.f32.mrf.mxu0 }
0x1122   :  { %2613 = vst.msk [vmem:[#allocation10 + $0x10] sm:$0xff] %vm104_vm0, %v2609_v50  ;;  %v2607_v51 = vadd.f32 %v2593_v12, %v3791_v2  ;;  %v2604_v52 = vadd.f32 %v3046_v39, %v2692_v38 }
0x1123   :  { %v2595_v53 = vpop.f32.mrf.mxu0 }
0x1124   :  { %2611 = vst.msk [vmem:[#allocation10] sm:$0xff] %vm104_vm0, %v2607_v51  ;;  %v2610_v55 = vadd.f32 %v2604_v52, %v3806_v14  ;;  %v2596_v56 = vadd.f32 %v2692_v38, %v2595_v53 }
0x1126   :  { %2614 = vst.msk [vmem:[#allocation10 + $0x18] sm:$0xff] %vm104_vm0, %v2610_v55  ;;  %v2608_v57 = vadd.f32 %v2596_v56, %v3804_v4 }
0x1128   :  { %2612 = vst.msk [vmem:[#allocation10 + $0x8] sm:$0xff] %vm104_vm0, %v2608_v57 }
0x1129   :  { %3267 = shalt.err (!%p3264_p10)
}
0x112a   :  { %s3303_s30 = smov 128   ;;  %s3304_s15 = smov 8  }
0x112b   :  { %2626 = dma.vmem_to_hbm [thread:$0]  %s2621_s9, 512, %s3879_s14, [#allocation4], %s3303_s30, %s3303_s30, %s3304_s15  }
0x112c   :  { %3282 = dma.done.wait [#allocation4], 512  }
0x112d   :  { %3283 = vsyncadd [#allocation4], 4294966784 }
0x112e   :  { %2630 = vsyncpa [#allocation3], 1 }
0x112f   :  { %2631 = vsyncpa [#allocation6], 1 }
0x1130   :  { %2632 = vsyncpa [#allocation9], 1 }
0x1131   :  { %2633 = vsyncpa [#allocation4], 1 }

</bundles_post_ra>
